<compile_context>
chip_gen: v6e
topology: v6e:2x2x1
jax: 0.10.0
libtpu: 0.0.40
codegen_flags: <defaults>
</compile_context>

<pallas_src>
import functools
import math

import jax
import jax.numpy as jnp
from jax.experimental import pallas as pl
from jax.experimental.pallas import tpu as pltpu

# ----- small synthetic config -----
BATCH = 2
SEQ = 8
HIDDEN = 32
NUM_HEADS = 4
INTERMEDIATE = 64
NUM_LAYERS = 2
VOCAB = 50
N_CLASSES = 3
LN_EPS = 1e-12
LANE = 128  # lane-dense slab width


def _layernorm(x, gamma, beta, eps=LN_EPS):
    mu = jnp.mean(x, axis=-1, keepdims=True)
    var = jnp.mean((x - mu) ** 2, axis=-1, keepdims=True)
    return (x - mu) * jax.lax.rsqrt(var + eps) * gamma + beta


# ---------------- fused BERT + pooler + classifier kernel (grid = encoder layers) ----------------
def bert_sentiment_kernel(x_ref, mask_ref, gvec_ref,
                          wqkv_ref, wo_ref, wi_ref, wf_ref, lvec_ref,
                          wp_ref, wc_ref, out_ref, x_sc, *, num_heads):
    l = pl.program_id(0)
    num_layers = pl.num_programs(0)
    B, S, H = x_ref.shape
    nh = num_heads
    hd = H // nh
    BS = B * S
    qkv_pad = wqkv_ref.shape[-1]          # 128 (lane-padded 3H)

    gv = gvec_ref[...]                    # (4, 128): emb LN gamma/beta, pooler bias, cls bias

    # --- layer 0: embedding LayerNorm into the running-activation scratch ---
    @pl.when(l == 0)
    def _():
        x0 = x_ref[...].astype(jnp.float32).reshape(BS, H)
        x_sc[...] = _layernorm(x0, gv[0:1, :H], gv[1:2, :H])

    lv = lvec_ref[...]                    # (8, 128) per-layer bias / LN slab
    x = x_sc[...]                         # (BS, H) fp32 running activation
    xb = x.astype(jnp.bfloat16)

    # Additive attention-mask bias (tiny; recomputed per layer on (B,S)).
    mask = mask_ref[...].astype(jnp.float32)
    neg = (1.0 - mask) * jnp.float32(-1e9)
    neg = jnp.broadcast_to(neg[:, None, None, :], (B, nh, 1, S)).reshape(B * nh, 1, S)

    # Packed QKV projection; 1/sqrt(hd) scale already folded into Wq/bq at pack time.
    # Output is lane-dense (BS, 128); lanes [0,3H) hold q|k|v, the rest are zero.
    qkv = jnp.dot(xb, wqkv_ref[...], preferred_element_type=jnp.float32) + lv[0:1, :]

    # Head split via reshape + batched minor-dim transposes (no per-head Python slicing).
    qkv_t = jnp.swapaxes(qkv.reshape(B, S, qkv_pad), 1, 2)       # (B, 128, S)
    q_t = qkv_t[:, 0 * H:1 * H, :].reshape(B * nh, hd, S)        # (B*nh, hd, S)
    k_t = qkv_t[:, 1 * H:2 * H, :].reshape(B * nh, hd, S)
    v_t = qkv_t[:, 2 * H:3 * H, :].reshape(B * nh, hd, S)
    qh = jnp.swapaxes(q_t, 1, 2).astype(jnp.bfloat16)            # (B*nh, S, hd)
    kb = k_t.astype(jnp.bfloat16)                                # (B*nh, hd, S)
    vb = v_t.astype(jnp.bfloat16)                                # (B*nh, hd, S)

    # Head-batched attention (canonical batched-matmul contractions only).
    # NOTE: for real S (e.g. 512) replace with a KV-tiled online-softmax (flash) loop.
    s = jnp.einsum('bqd,bdk->bqk', qh, kb,
                   preferred_element_type=jnp.float32) + neg     # (B*nh, S, S)
    s = s - jnp.max(s, axis=-1, keepdims=True)
    p = jnp.exp(s)
    p = p * pl.reciprocal(jnp.sum(p, axis=-1, keepdims=True), approx=True)
    ctx = jnp.einsum('bqk,bdk->bqd', p.astype(jnp.bfloat16), vb,
                     preferred_element_type=jnp.float32)         # (B*nh, S, hd)

    # Merge heads back to (BS, H): reshape + two batched minor-dim transposes.
    ctx_t = jnp.swapaxes(ctx, 1, 2).reshape(B, H, S)             # (B, H, S)
    ctx2 = jnp.swapaxes(ctx_t, 1, 2).reshape(BS, H)              # (BS, H)

    attn = jnp.dot(ctx2.astype(jnp.bfloat16), wo_ref[...],
                   preferred_element_type=jnp.float32) + lv[1:2, :H]
    h1 = _layernorm(x + attn, lv[4:5, :H], lv[5:6, :H])

    # FFN: lane-padded intermediate (BS, 128); pad lanes stay exactly zero through GELU.
    ff = jnp.dot(h1.astype(jnp.bfloat16), wi_ref[...],
                 preferred_element_type=jnp.float32) + lv[2:3, :]
    ff = jax.nn.gelu(ff, approximate=True)                       # tanh-GELU (EUP); HF BERT uses erf
    ff = jnp.dot(ff.astype(jnp.bfloat16), wf_ref[...],
                 preferred_element_type=jnp.float32) + lv[3:4, :H]
    x_new = _layernorm(h1 + ff, lv[6:7, :H], lv[7:8, :H])
    x_sc[...] = x_new

    # --- last layer: pooler on [CLS], classifier, softmax over padded 128-lane slab ---
    @pl.when(l == num_layers - 1)
    def _():
        cls = x_new.reshape(B, S, H)[:, 0, :]                    # (B, H) view, no concat
        pooled = jnp.tanh(jnp.dot(cls.astype(jnp.bfloat16), wp_ref[...],
                                  preferred_element_type=jnp.float32) + gv[2:3, :H])
        # TODO(synk): nn.Dropout(p=0.35) is identity at inference; training-time mask omitted.
        logits = jnp.dot(pooled.astype(jnp.bfloat16), wc_ref[...],
                         preferred_element_type=jnp.float32) + gv[3:4, :]   # (B, 128)
        logits = logits - jnp.max(logits, axis=1, keepdims=True)
        e = jnp.exp(logits)                                      # pad lanes biased -1e9 -> 0
        out_ref[...] = (e / jnp.sum(e, axis=1, keepdims=True)).astype(out_ref.dtype)


def fused_forward_call(x_emb, mask, packed):
    B, S, H = x_emb.shape
    L = NUM_LAYERS
    kernel = functools.partial(bert_sentiment_kernel, num_heads=NUM_HEADS)

    probs_pad = pl.pallas_call(
        kernel,
        out_shape=jax.ShapeDtypeStruct((B, LANE), jnp.float32),
        grid=(L,),
        in_specs=[
            pl.BlockSpec((B, S, H), lambda l: (0, 0, 0)),          # embeddings (used at l==0)
            pl.BlockSpec((B, S), lambda l: (0, 0)),                # attention mask
            pl.BlockSpec((4, LANE), lambda l: (0, 0)),             # global vec slab (f32)
            pl.BlockSpec((None, H, LANE), lambda l: (l, 0, 0)),    # Wqkv, lane-padded (bf16)
            pl.BlockSpec((None, H, H), lambda l: (l, 0, 0)),       # Wo (bf16)
            pl.BlockSpec((None, H, LANE), lambda l: (l, 0, 0)),    # Wi, lane-padded (bf16)
            pl.BlockSpec((None, LANE, H), lambda l: (l, 0, 0)),    # Wf, row-padded (bf16)
            pl.BlockSpec((None, 8, LANE), lambda l: (l, 0, 0)),    # per-layer bias/LN slab (f32)
            pl.BlockSpec((H, H), lambda l: (0, 0)),                # pooler weight (bf16)
            pl.BlockSpec((H, LANE), lambda l: (0, 0)),             # classifier weight, padded (bf16)
        ],
        out_specs=pl.BlockSpec((B, LANE), lambda l: (0, 0)),
        scratch_shapes=[pltpu.VMEM((B * S, H), jnp.float32)],      # running activation
        compiler_params=pltpu.CompilerParams(
            dimension_semantics=("arbitrary",),                    # layer axis is sequential
            vmem_limit_bytes=48 * 1024 * 1024,                     # > v5e 16MiB default, < v7x 64MiB
        ),
    )(x_emb, mask, packed["gvec"], packed["wqkv"], packed["wo"], packed["wi"],
      packed["wf"], packed["lvec"], packed["wp"], packed["wc"])
    return probs_pad[:, :N_CLASSES]


# ---------------- parameter init (deterministic, synthetic) & packing ----------------
def init_params(key):
    keys = iter(jax.random.split(key, 128))

    def w(shape, scale=0.02):
        return scale * jax.random.normal(next(keys), shape, dtype=jnp.float32)

    params = {
        "tok_emb": w((VOCAB, HIDDEN)),
        "pos_emb": w((SEQ, HIDDEN)),
        "typ_emb": w((1, HIDDEN)),
        "emb_g": jnp.ones((1, HIDDEN), jnp.float32),
        "emb_b": jnp.zeros((1, HIDDEN), jnp.float32),
        "layers": [],
        "wp": w((HIDDEN, HIDDEN)),                       # BERT pooler
        "bp": jnp.zeros((1, HIDDEN), jnp.float32),
        "wc": w((HIDDEN, N_CLASSES)),                    # self.out = nn.Linear(H, n_classes)
        "bc": jnp.zeros((1, N_CLASSES), jnp.float32),
    }
    for _ in range(NUM_LAYERS):
        params["layers"].append({
            "wq": w((HIDDEN, HIDDEN)), "bq": jnp.zeros((1, HIDDEN), jnp.float32),
            "wk": w((HIDDEN, HIDDEN)), "bk": jnp.zeros((1, HIDDEN), jnp.float32),
            "wv": w((HIDDEN, HIDDEN)), "bv": jnp.zeros((1, HIDDEN), jnp.float32),
            "wo": w((HIDDEN, HIDDEN)), "bo": jnp.zeros((1, HIDDEN), jnp.float32),
            "g1": jnp.ones((1, HIDDEN), jnp.float32), "b1": jnp.zeros((1, HIDDEN), jnp.float32),
            "wi": w((HIDDEN, INTERMEDIATE)), "bi": jnp.zeros((1, INTERMEDIATE), jnp.float32),
            "wf": w((INTERMEDIATE, HIDDEN)), "bf": jnp.zeros((1, HIDDEN), jnp.float32),
            "g2": jnp.ones((1, HIDDEN), jnp.float32), "b2": jnp.zeros((1, HIDDEN), jnp.float32),
        })
    return params


def pack_params(params):
    """One-time layout plumbing: bf16 weights, lane-dense (128-wide) slabs, scale fold."""
    layers = params["layers"]
    scale = jnp.float32(1.0 / math.sqrt(HIDDEN // NUM_HEADS))

    def row(vec):
        v = jnp.asarray(vec, jnp.float32).reshape(-1)
        return jnp.pad(v, (0, LANE - v.shape[0]))

    def pad_lanes(m):
        return jnp.pad(m, ((0, 0), (0, LANE - m.shape[1])))

    # Wqkv with the attention scale folded into Wq; lane-padded 3H=96 -> 128.
    wqkv = jnp.stack([pad_lanes(jnp.concatenate(
        [lp["wq"] * scale, lp["wk"], lp["wv"]], axis=1)) for lp in layers]).astype(jnp.bfloat16)
    wo = jnp.stack([lp["wo"] for lp in layers]).astype(jnp.bfloat16)            # (L, H, H)
    wi = jnp.stack([pad_lanes(lp["wi"]) for lp in layers]).astype(jnp.bfloat16) # (L, H, 128)
    wf = jnp.stack([jnp.pad(lp["wf"], ((0, LANE - INTERMEDIATE), (0, 0)))
                    for lp in layers]).astype(jnp.bfloat16)                     # (L, 128, H)
    lvec = jnp.stack([jnp.stack([
        row(jnp.concatenate([lp["bq"] * scale, lp["bk"], lp["bv"]], axis=1)),   # 0: bqkv (scaled bq)
        row(lp["bo"]),                                                          # 1: bo
        row(lp["bi"]),                                                          # 2: bi (padded)
        row(lp["bf"]),                                                          # 3: bf
        row(lp["g1"]), row(lp["b1"]),                                           # 4,5: LN1
        row(lp["g2"]), row(lp["b2"]),                                           # 6,7: LN2
    ]) for lp in layers])                                                       # (L, 8, 128) f32

    bc_pad = jnp.full((LANE,), -1e9, jnp.float32).at[:N_CLASSES].set(
        params["bc"].reshape(-1))
    gvec = jnp.stack([row(params["emb_g"]), row(params["emb_b"]),
                      row(params["bp"]), bc_pad])                               # (4, 128) f32

    wc_pad = jnp.pad(params["wc"], ((0, 0), (0, LANE - N_CLASSES))).astype(jnp.bfloat16)
    return {"wqkv": wqkv, "wo": wo, "wi": wi, "wf": wf, "lvec": lvec,
            "gvec": gvec, "wp": params["wp"].astype(jnp.bfloat16), "wc": wc_pad}


# ---------------- full forward: bert(...) -> pooled -> drop -> linear -> softmax ----------------
def sentiment_classifier_forward(params, input_ids, attention_mask):
    packed = pack_params(params)
    # glue: embedding lookup (token + position + segment)
    x_emb = (params["tok_emb"][input_ids]
             + params["pos_emb"][None, :, :]
             + params["typ_emb"][None, :, :]).astype(jnp.float32)        # (B, S, H)
    mask = attention_mask.astype(jnp.float32)                            # (B, S)
    return fused_forward_call(x_emb, mask, packed)


if __name__ == "__main__":
    key = jax.random.PRNGKey(0)
    kp, kid = jax.random.split(key)
    params = init_params(kp)
    input_ids = jax.random.randint(kid, (BATCH, SEQ), 0, VOCAB, dtype=jnp.int32)
    attention_mask = jnp.array([[1, 1, 1, 1, 1, 1, 1, 1],
                                [1, 1, 1, 1, 1, 1, 0, 0]], dtype=jnp.int32)

    probs = sentiment_classifier_forward(params, input_ids, attention_mask)
    probs = jax.block_until_ready(probs)

    assert probs.shape == (BATCH, N_CLASSES)
    assert bool(jnp.allclose(jnp.sum(probs, axis=1), 1.0, atol=1e-4))
    print("KERNEL_OK")
</pallas_src>

<mosaic_0001>
module attributes {stable_mosaic.version = 11 : i64} {
  func.func @bert_sentiment_kernel(%arg0: i32, %arg1: memref<2x8x32xf32, #tpu.memory_space<vmem>>, %arg2: memref<2x8xf32, #tpu.memory_space<vmem>>, %arg3: memref<4x128xf32, #tpu.memory_space<vmem>>, %arg4: memref<1x32x128xbf16, #tpu.memory_space<vmem>>, %arg5: memref<1x32x32xbf16, #tpu.memory_space<vmem>>, %arg6: memref<1x32x128xbf16, #tpu.memory_space<vmem>>, %arg7: memref<1x128x32xbf16, #tpu.memory_space<vmem>>, %arg8: memref<1x8x128xf32, #tpu.memory_space<vmem>>, %arg9: memref<32x32xbf16, #tpu.memory_space<vmem>>, %arg10: memref<32x128xbf16, #tpu.memory_space<vmem>>, %arg11: memref<2x128xf32, #tpu.memory_space<vmem>>, %arg12: memref<16x32xf32, #tpu.memory_space<vmem>>) attributes {dimension_semantics = [#tpu.dimension_semantics<arbitrary>], iteration_bounds = array<i64: 2>, scalar_prefetch = 0 : i64, scratch_operands = 1 : i64, tpu.core_type = #tpu.core_type<tc>, window_params = [{pipeline_mode = #tpu.pipeline_mode<synchronous>, transform_indices = @transform_0, window_bounds = array<i64: 2, 8, 32>}, {pipeline_mode = #tpu.pipeline_mode<synchronous>, transform_indices = @transform_1, window_bounds = array<i64: 2, 8>}, {pipeline_mode = #tpu.pipeline_mode<synchronous>, transform_indices = @transform_2, window_bounds = array<i64: 4, 128>}, {transform_indices = @transform_3, window_bounds = array<i64: 1, 32, 128>}, {transform_indices = @transform_4, window_bounds = array<i64: 1, 32, 32>}, {transform_indices = @transform_5, window_bounds = array<i64: 1, 32, 128>}, {transform_indices = @transform_6, window_bounds = array<i64: 1, 128, 32>}, {transform_indices = @transform_7, window_bounds = array<i64: 1, 8, 128>}, {pipeline_mode = #tpu.pipeline_mode<synchronous>, transform_indices = @transform_8, window_bounds = array<i64: 32, 32>}, {pipeline_mode = #tpu.pipeline_mode<synchronous>, transform_indices = @transform_9, window_bounds = array<i64: 32, 128>}, {pipeline_mode = #tpu.pipeline_mode<synchronous>, transform_indices = @transform_10, window_bounds = array<i64: 2, 128>}]} {
    %c0 = arith.constant 0 : index
    %c0_0 = arith.constant 0 : index
    %0 = vector.load %arg3[%c0, %c0_0] : memref<4x128xf32, #tpu.memory_space<vmem>>, vector<4x128xf32>
    %c0_i32 = arith.constant 0 : i32
    %1 = arith.cmpi eq, %arg0, %c0_i32 : i32
    %2 = arith.extui %1 : i1 to i32
    %c0_i32_1 = arith.constant 0 : i32
    %3 = arith.cmpi ne, %2, %c0_i32_1 : i32
    scf.if %3 {
      %c0_47 = arith.constant 0 : index
      %c0_48 = arith.constant 0 : index
      %c0_49 = arith.constant 0 : index
      %142 = vector.load %arg1[%c0_47, %c0_48, %c0_49] : memref<2x8x32xf32, #tpu.memory_space<vmem>>, vector<2x8x32xf32>
      %143 = vector.shape_cast %142 : vector<2x8x32xf32> to vector<16x32xf32>
      %144 = vector.extract_strided_slice %0 {offsets = [0, 0], sizes = [1, 32], strides = [1, 1]} : vector<4x128xf32> to vector<1x32xf32>
      %145 = vector.extract_strided_slice %0 {offsets = [1, 0], sizes = [1, 32], strides = [1, 1]} : vector<4x128xf32> to vector<1x32xf32>
      %cst_50 = arith.constant dense<0.000000e+00> : vector<16xf32>
      %146 = vector.multi_reduction <add>, %143, %cst_50 [1] : vector<16x32xf32> to vector<16xf32>
      %147 = vector.shape_cast %146 : vector<16xf32> to vector<16x1xf32>
      %cst_51 = arith.constant 3.200000e+01 : f32
      %148 = vector.broadcast %cst_51 : f32 to vector<16x1xf32>
      %149 = arith.divf %147, %148 : vector<16x1xf32>
      %150 = vector.broadcast %149 : vector<16x1xf32> to vector<16x32xf32>
      %151 = arith.subf %143, %150 : vector<16x32xf32>
      %152 = arith.mulf %151, %151 : vector<16x32xf32>
      %cst_52 = arith.constant dense<0.000000e+00> : vector<16xf32>
      %153 = vector.multi_reduction <add>, %152, %cst_52 [1] : vector<16x32xf32> to vector<16xf32>
      %154 = vector.shape_cast %153 : vector<16xf32> to vector<16x1xf32>
      %cst_53 = arith.constant 3.200000e+01 : f32
      %155 = vector.broadcast %cst_53 : f32 to vector<16x1xf32>
      %156 = arith.divf %154, %155 : vector<16x1xf32>
      %157 = vector.broadcast %149 : vector<16x1xf32> to vector<16x32xf32>
      %158 = arith.subf %143, %157 : vector<16x32xf32>
      %cst_54 = arith.constant 9.99999996E-13 : f32
      %159 = vector.broadcast %cst_54 : f32 to vector<16x1xf32>
      %160 = arith.addf %156, %159 : vector<16x1xf32>
      %161 = math.rsqrt %160 : vector<16x1xf32>
      %162 = vector.broadcast %161 : vector<16x1xf32> to vector<16x32xf32>
      %163 = arith.mulf %158, %162 : vector<16x32xf32>
      %164 = vector.broadcast %144 : vector<1x32xf32> to vector<16x32xf32>
      %165 = arith.mulf %163, %164 : vector<16x32xf32>
      %166 = vector.broadcast %145 : vector<1x32xf32> to vector<16x32xf32>
      %167 = arith.addf %165, %166 : vector<16x32xf32>
      %c0_55 = arith.constant 0 : index
      %c0_56 = arith.constant 0 : index
      %168 = vector.load %arg12[%c0_55, %c0_56] : memref<16x32xf32, #tpu.memory_space<vmem>>, vector<16x32xf32>
      tpu.vector_store %arg12[%c0_55, %c0_56], %167 {strides = array<i32>} : memref<16x32xf32, #tpu.memory_space<vmem>>, vector<16x32xf32>,
    } else {
    }
    %c0_2 = arith.constant 0 : index
    %c0_3 = arith.constant 0 : index
    %c0_4 = arith.constant 0 : index
    %4 = vector.load %arg8[%c0_2, %c0_3, %c0_4] : memref<1x8x128xf32, #tpu.memory_space<vmem>>, vector<1x8x128xf32>
    %5 = vector.shape_cast %4 : vector<1x8x128xf32> to vector<8x128xf32>
    %c0_5 = arith.constant 0 : index
    %c0_6 = arith.constant 0 : index
    %6 = vector.load %arg12[%c0_5, %c0_6] : memref<16x32xf32, #tpu.memory_space<vmem>>, vector<16x32xf32>
    %7 = arith.truncf %6 : vector<16x32xf32> to vector<16x32xbf16>
    %c0_7 = arith.constant 0 : index
    %c0_8 = arith.constant 0 : index
    %8 = vector.load %arg2[%c0_7, %c0_8] : memref<2x8xf32, #tpu.memory_space<vmem>>, vector<2x8xf32>
    %cst = arith.constant 1.000000e+00 : f32
    %9 = vector.broadcast %cst : f32 to vector<2x8xf32>
    %10 = arith.subf %9, %8 : vector<2x8xf32>
    %cst_9 = arith.constant -1.000000e+09 : f32
    %11 = vector.broadcast %cst_9 : f32 to vector<2x8xf32>
    %12 = arith.mulf %10, %11 : vector<2x8xf32>
    %13 = vector.shape_cast %12 : vector<2x8xf32> to vector<2x1x1x8xf32>
    %14 = vector.shape_cast %13 : vector<2x1x1x8xf32> to vector<2x1x1x8xf32>
    %15 = vector.broadcast %14 : vector<2x1x1x8xf32> to vector<2x4x1x8xf32>
    %16 = vector.shape_cast %15 : vector<2x4x1x8xf32> to vector<8x1x8xf32>
    %c0_10 = arith.constant 0 : index
    %c0_11 = arith.constant 0 : index
    %c0_12 = arith.constant 0 : index
    %17 = vector.load %arg4[%c0_10, %c0_11, %c0_12] : memref<1x32x128xbf16, #tpu.memory_space<vmem>>, vector<1x32x128xbf16>
    %18 = vector.shape_cast %17 : vector<1x32x128xbf16> to vector<32x128xbf16>
    %cst_13 = arith.constant dense<0.000000e+00> : vector<16x128xf32>
    %19 = tpu.matmul %7, %18, %cst_13 {dimension_numbers = #tpu.dot_dimension_numbers<[1], [0], [0], [1], [0, 0, 1, 1], [], []>} : vector<16x32xbf16>, vector<32x128xbf16>, vector<16x128xf32> -> vector<16x128xf32>
    %20 = vector.extract_strided_slice %5 {offsets = [0, 0], sizes = [1, 128], strides = [1, 1]} : vector<8x128xf32> to vector<1x128xf32>
    %21 = vector.broadcast %20 : vector<1x128xf32> to vector<16x128xf32>
    %22 = arith.addf %19, %21 : vector<16x128xf32>
    %23 = vector.shape_cast %22 : vector<16x128xf32> to vector<2x8x128xf32>
    %24 = tpu.transpose %23, [0, 2, 1] : vector<2x8x128xf32> -> vector<2x128x8xf32>
    %25 = vector.extract_strided_slice %24 {offsets = [0, 0, 0], sizes = [2, 32, 8], strides = [1, 1, 1]} : vector<2x128x8xf32> to vector<2x32x8xf32>
    %26 = vector.shape_cast %25 : vector<2x32x8xf32> to vector<8x8x8xf32>
    %27 = vector.extract_strided_slice %24 {offsets = [0, 32, 0], sizes = [2, 32, 8], strides = [1, 1, 1]} : vector<2x128x8xf32> to vector<2x32x8xf32>
    %28 = vector.shape_cast %27 : vector<2x32x8xf32> to vector<8x8x8xf32>
    %29 = vector.extract_strided_slice %24 {offsets = [0, 64, 0], sizes = [2, 32, 8], strides = [1, 1, 1]} : vector<2x128x8xf32> to vector<2x32x8xf32>
    %30 = vector.shape_cast %29 : vector<2x32x8xf32> to vector<8x8x8xf32>
    %31 = tpu.transpose %26, [0, 2, 1] : vector<8x8x8xf32> -> vector<8x8x8xf32>
    %32 = arith.truncf %31 : vector<8x8x8xf32> to vector<8x8x8xbf16>
    %33 = arith.truncf %28 : vector<8x8x8xf32> to vector<8x8x8xbf16>
    %34 = arith.truncf %30 : vector<8x8x8xf32> to vector<8x8x8xbf16>
    "tpu.trace_start"() <{level = 10 : i32, message = "bqd,bdk->bqk"}> : () -> ()
    %cst_14 = arith.constant dense<0.000000e+00> : vector<8x8x8xf32>
    %35 = tpu.matmul %32, %33, %cst_14 {dimension_numbers = #tpu.dot_dimension_numbers<[2], [1], [1], [2], [0, 0, 0, 1, 1, 2], [0], [0]>} : vector<8x8x8xbf16>, vector<8x8x8xbf16>, vector<8x8x8xf32> -> vector<8x8x8xf32>
    "tpu.trace_stop"() : () -> ()
    %36 = vector.broadcast %16 : vector<8x1x8xf32> to vector<8x8x8xf32>
    %37 = arith.addf %35, %36 : vector<8x8x8xf32>
    %cst_15 = arith.constant dense<0xFF800000> : vector<8x8xf32>
    %38 = vector.multi_reduction <maximumf>, %37, %cst_15 [2] : vector<8x8x8xf32> to vector<8x8xf32>
    %39 = vector.shape_cast %38 : vector<8x8xf32> to vector<8x8x1xf32>
    %40 = vector.broadcast %39 : vector<8x8x1xf32> to vector<8x8x8xf32>
    %41 = arith.subf %37, %40 : vector<8x8x8xf32>
    %42 = math.exp %41 : vector<8x8x8xf32>
    %cst_16 = arith.constant dense<0.000000e+00> : vector<8x8xf32>
    %43 = vector.multi_reduction <add>, %42, %cst_16 [2] : vector<8x8x8xf32> to vector<8x8xf32>
    %44 = vector.shape_cast %43 : vector<8x8xf32> to vector<8x8x1xf32>
    %45 = tpu.reciprocal %44 {approx = true} : vector<8x8x1xf32> -> vector<8x8x1xf32>
    %46 = vector.broadcast %45 : vector<8x8x1xf32> to vector<8x8x8xf32>
    %47 = arith.mulf %42, %46 : vector<8x8x8xf32>
    %48 = arith.truncf %47 : vector<8x8x8xf32> to vector<8x8x8xbf16>
    "tpu.trace_start"() <{level = 10 : i32, message = "bqk,bdk->bqd"}> : () -> ()
    %cst_17 = arith.constant dense<0.000000e+00> : vector<8x8x8xf32>
    %49 = tpu.matmul %48, %34, %cst_17 {dimension_numbers = #tpu.dot_dimension_numbers<[2], [2], [1], [1], [0, 0, 0, 1, 1, 1], [0], [0]>} : vector<8x8x8xbf16>, vector<8x8x8xbf16>, vector<8x8x8xf32> -> vector<8x8x8xf32>
    "tpu.trace_stop"() : () -> ()
    %50 = tpu.transpose %49, [0, 2, 1] : vector<8x8x8xf32> -> vector<8x8x8xf32>
    %51 = vector.shape_cast %50 : vector<8x8x8xf32> to vector<2x32x8xf32>
    %52 = tpu.transpose %51, [0, 2, 1] : vector<2x32x8xf32> -> vector<2x8x32xf32>
    %53 = vector.shape_cast %52 : vector<2x8x32xf32> to vector<16x32xf32>
    %54 = arith.truncf %53 : vector<16x32xf32> to vector<16x32xbf16>
    %c0_18 = arith.constant 0 : index
    %c0_19 = arith.constant 0 : index
    %c0_20 = arith.constant 0 : index
    %55 = vector.load %arg5[%c0_18, %c0_19, %c0_20] : memref<1x32x32xbf16, #tpu.memory_space<vmem>>, vector<1x32x32xbf16>
    %56 = vector.shape_cast %55 : vector<1x32x32xbf16> to vector<32x32xbf16>
    %cst_21 = arith.constant dense<0.000000e+00> : vector<16x32xf32>
    %57 = tpu.matmul %54, %56, %cst_21 {dimension_numbers = #tpu.dot_dimension_numbers<[1], [0], [0], [1], [0, 0, 1, 1], [], []>} : vector<16x32xbf16>, vector<32x32xbf16>, vector<16x32xf32> -> vector<16x32xf32>
    %58 = vector.extract_strided_slice %5 {offsets = [1, 0], sizes = [1, 32], strides = [1, 1]} : vector<8x128xf32> to vector<1x32xf32>
    %59 = vector.broadcast %58 : vector<1x32xf32> to vector<16x32xf32>
    %60 = arith.addf %57, %59 : vector<16x32xf32>
    %61 = arith.addf %6, %60 : vector<16x32xf32>
    %62 = vector.extract_strided_slice %5 {offsets = [4, 0], sizes = [1, 32], strides = [1, 1]} : vector<8x128xf32> to vector<1x32xf32>
    %63 = vector.extract_strided_slice %5 {offsets = [5, 0], sizes = [1, 32], strides = [1, 1]} : vector<8x128xf32> to vector<1x32xf32>
    %cst_22 = arith.constant dense<0.000000e+00> : vector<16xf32>
    %64 = vector.multi_reduction <add>, %61, %cst_22 [1] : vector<16x32xf32> to vector<16xf32>
    %65 = vector.shape_cast %64 : vector<16xf32> to vector<16x1xf32>
    %cst_23 = arith.constant 3.200000e+01 : f32
    %66 = vector.broadcast %cst_23 : f32 to vector<16x1xf32>
    %67 = arith.divf %65, %66 : vector<16x1xf32>
    %68 = vector.broadcast %67 : vector<16x1xf32> to vector<16x32xf32>
    %69 = arith.subf %61, %68 : vector<16x32xf32>
    %70 = arith.mulf %69, %69 : vector<16x32xf32>
    %cst_24 = arith.constant dense<0.000000e+00> : vector<16xf32>
    %71 = vector.multi_reduction <add>, %70, %cst_24 [1] : vector<16x32xf32> to vector<16xf32>
    %72 = vector.shape_cast %71 : vector<16xf32> to vector<16x1xf32>
    %cst_25 = arith.constant 3.200000e+01 : f32
    %73 = vector.broadcast %cst_25 : f32 to vector<16x1xf32>
    %74 = arith.divf %72, %73 : vector<16x1xf32>
    %75 = vector.broadcast %67 : vector<16x1xf32> to vector<16x32xf32>
    %76 = arith.subf %61, %75 : vector<16x32xf32>
    %cst_26 = arith.constant 9.99999996E-13 : f32
    %77 = vector.broadcast %cst_26 : f32 to vector<16x1xf32>
    %78 = arith.addf %74, %77 : vector<16x1xf32>
    %79 = math.rsqrt %78 : vector<16x1xf32>
    %80 = vector.broadcast %79 : vector<16x1xf32> to vector<16x32xf32>
    %81 = arith.mulf %76, %80 : vector<16x32xf32>
    %82 = vector.broadcast %62 : vector<1x32xf32> to vector<16x32xf32>
    %83 = arith.mulf %81, %82 : vector<16x32xf32>
    %84 = vector.broadcast %63 : vector<1x32xf32> to vector<16x32xf32>
    %85 = arith.addf %83, %84 : vector<16x32xf32>
    %86 = arith.truncf %85 : vector<16x32xf32> to vector<16x32xbf16>
    %c0_27 = arith.constant 0 : index
    %c0_28 = arith.constant 0 : index
    %c0_29 = arith.constant 0 : index
    %87 = vector.load %arg6[%c0_27, %c0_28, %c0_29] : memref<1x32x128xbf16, #tpu.memory_space<vmem>>, vector<1x32x128xbf16>
    %88 = vector.shape_cast %87 : vector<1x32x128xbf16> to vector<32x128xbf16>
    %cst_30 = arith.constant dense<0.000000e+00> : vector<16x128xf32>
    %89 = tpu.matmul %86, %88, %cst_30 {dimension_numbers = #tpu.dot_dimension_numbers<[1], [0], [0], [1], [0, 0, 1, 1], [], []>} : vector<16x32xbf16>, vector<32x128xbf16>, vector<16x128xf32> -> vector<16x128xf32>
    %90 = vector.extract_strided_slice %5 {offsets = [2, 0], sizes = [1, 128], strides = [1, 1]} : vector<8x128xf32> to vector<1x128xf32>
    %91 = vector.broadcast %90 : vector<1x128xf32> to vector<16x128xf32>
    %92 = arith.addf %89, %91 : vector<16x128xf32>
    %93 = arith.mulf %92, %92 : vector<16x128xf32>
    %94 = arith.mulf %92, %93 : vector<16x128xf32>
    %cst_31 = arith.constant 4.471500e-02 : f32
    %95 = vector.broadcast %cst_31 : f32 to vector<16x128xf32>
    %96 = arith.mulf %95, %94 : vector<16x128xf32>
    %97 = arith.addf %92, %96 : vector<16x128xf32>
    %cst_32 = arith.constant 0.797884583 : f32
    %98 = vector.broadcast %cst_32 : f32 to vector<16x128xf32>
    %99 = arith.mulf %98, %97 : vector<16x128xf32>
    %100 = math.tanh %99 : vector<16x128xf32>
    %cst_33 = arith.constant 1.000000e+00 : f32
    %101 = vector.broadcast %cst_33 : f32 to vector<16x128xf32>
    %102 = arith.addf %101, %100 : vector<16x128xf32>
    %cst_34 = arith.constant 5.000000e-01 : f32
    %103 = vector.broadcast %cst_34 : f32 to vector<16x128xf32>
    %104 = arith.mulf %103, %102 : vector<16x128xf32>
    %105 = arith.mulf %92, %104 : vector<16x128xf32>
    %106 = arith.truncf %105 : vector<16x128xf32> to vector<16x128xbf16>
    %c0_35 = arith.constant 0 : index
    %c0_36 = arith.constant 0 : index
    %c0_37 = arith.constant 0 : index
    %107 = vector.load %arg7[%c0_35, %c0_36, %c0_37] : memref<1x128x32xbf16, #tpu.memory_space<vmem>>, vector<1x128x32xbf16>
    %108 = vector.shape_cast %107 : vector<1x128x32xbf16> to vector<128x32xbf16>
    %cst_38 = arith.constant dense<0.000000e+00> : vector<16x32xf32>
    %109 = tpu.matmul %106, %108, %cst_38 {dimension_numbers = #tpu.dot_dimension_numbers<[1], [0], [0], [1], [0, 0, 1, 1], [], []>} : vector<16x128xbf16>, vector<128x32xbf16>, vector<16x32xf32> -> vector<16x32xf32>
    %110 = vector.extract_strided_slice %5 {offsets = [3, 0], sizes = [1, 32], strides = [1, 1]} : vector<8x128xf32> to vector<1x32xf32>
    %111 = vector.broadcast %110 : vector<1x32xf32> to vector<16x32xf32>
    %112 = arith.addf %109, %111 : vector<16x32xf32>
    %113 = arith.addf %85, %112 : vector<16x32xf32>
    %114 = vector.extract_strided_slice %5 {offsets = [6, 0], sizes = [1, 32], strides = [1, 1]} : vector<8x128xf32> to vector<1x32xf32>
    %115 = vector.extract_strided_slice %5 {offsets = [7, 0], sizes = [1, 32], strides = [1, 1]} : vector<8x128xf32> to vector<1x32xf32>
    %cst_39 = arith.constant dense<0.000000e+00> : vector<16xf32>
    %116 = vector.multi_reduction <add>, %113, %cst_39 [1] : vector<16x32xf32> to vector<16xf32>
    %117 = vector.shape_cast %116 : vector<16xf32> to vector<16x1xf32>
    %cst_40 = arith.constant 3.200000e+01 : f32
    %118 = vector.broadcast %cst_40 : f32 to vector<16x1xf32>
    %119 = arith.divf %117, %118 : vector<16x1xf32>
    %120 = vector.broadcast %119 : vector<16x1xf32> to vector<16x32xf32>
    %121 = arith.subf %113, %120 : vector<16x32xf32>
    %122 = arith.mulf %121, %121 : vector<16x32xf32>
    %cst_41 = arith.constant dense<0.000000e+00> : vector<16xf32>
    %123 = vector.multi_reduction <add>, %122, %cst_41 [1] : vector<16x32xf32> to vector<16xf32>
    %124 = vector.shape_cast %123 : vector<16xf32> to vector<16x1xf32>
    %cst_42 = arith.constant 3.200000e+01 : f32
    %125 = vector.broadcast %cst_42 : f32 to vector<16x1xf32>
    %126 = arith.divf %124, %125 : vector<16x1xf32>
    %127 = vector.broadcast %119 : vector<16x1xf32> to vector<16x32xf32>
    %128 = arith.subf %113, %127 : vector<16x32xf32>
    %cst_43 = arith.constant 9.99999996E-13 : f32
    %129 = vector.broadcast %cst_43 : f32 to vector<16x1xf32>
    %130 = arith.addf %126, %129 : vector<16x1xf32>
    %131 = math.rsqrt %130 : vector<16x1xf32>
    %132 = vector.broadcast %131 : vector<16x1xf32> to vector<16x32xf32>
    %133 = arith.mulf %128, %132 : vector<16x32xf32>
    %134 = vector.broadcast %114 : vector<1x32xf32> to vector<16x32xf32>
    %135 = arith.mulf %133, %134 : vector<16x32xf32>
    %136 = vector.broadcast %115 : vector<1x32xf32> to vector<16x32xf32>
    %137 = arith.addf %135, %136 : vector<16x32xf32>
    %c0_44 = arith.constant 0 : index
    %c0_45 = arith.constant 0 : index
    %138 = vector.load %arg12[%c0_44, %c0_45] : memref<16x32xf32, #tpu.memory_space<vmem>>, vector<16x32xf32>
    tpu.vector_store %arg12[%c0_44, %c0_45], %137 {strides = array<i32>} : memref<16x32xf32, #tpu.memory_space<vmem>>, vector<16x32xf32>,
    %c1_i32 = arith.constant 1 : i32
    %139 = arith.cmpi eq, %arg0, %c1_i32 : i32
    %140 = arith.extui %139 : i1 to i32
    %c0_i32_46 = arith.constant 0 : i32
    %141 = arith.cmpi ne, %140, %c0_i32_46 : i32
    scf.if %141 {
      %142 = vector.shape_cast %137 : vector<16x32xf32> to vector<2x8x32xf32>
      %143 = vector.extract_strided_slice %142 {offsets = [0, 0, 0], sizes = [2, 1, 32], strides = [1, 1, 1]} : vector<2x8x32xf32> to vector<2x1x32xf32>
      %144 = vector.shape_cast %143 : vector<2x1x32xf32> to vector<2x32xf32>
      %145 = arith.truncf %144 : vector<2x32xf32> to vector<2x32xbf16>
      %c0_47 = arith.constant 0 : index
      %c0_48 = arith.constant 0 : index
      %146 = vector.load %arg9[%c0_47, %c0_48] : memref<32x32xbf16, #tpu.memory_space<vmem>>, vector<32x32xbf16>
      %cst_49 = arith.constant dense<0.000000e+00> : vector<2x32xf32>
      %147 = tpu.matmul %145, %146, %cst_49 {dimension_numbers = #tpu.dot_dimension_numbers<[1], [0], [0], [1], [0, 0, 1, 1], [], []>} : vector<2x32xbf16>, vector<32x32xbf16>, vector<2x32xf32> -> vector<2x32xf32>
      %148 = vector.extract_strided_slice %0 {offsets = [2, 0], sizes = [1, 32], strides = [1, 1]} : vector<4x128xf32> to vector<1x32xf32>
      %149 = vector.broadcast %148 : vector<1x32xf32> to vector<2x32xf32>
      %150 = arith.addf %147, %149 : vector<2x32xf32>
      %151 = math.tanh %150 : vector<2x32xf32>
      %152 = arith.truncf %151 : vector<2x32xf32> to vector<2x32xbf16>
      %c0_50 = arith.constant 0 : index
      %c0_51 = arith.constant 0 : index
      %153 = vector.load %arg10[%c0_50, %c0_51] : memref<32x128xbf16, #tpu.memory_space<vmem>>, vector<32x128xbf16>
      %cst_52 = arith.constant dense<0.000000e+00> : vector<2x128xf32>
      %154 = tpu.matmul %152, %153, %cst_52 {dimension_numbers = #tpu.dot_dimension_numbers<[1], [0], [0], [1], [0, 0, 1, 1], [], []>} : vector<2x32xbf16>, vector<32x128xbf16>, vector<2x128xf32> -> vector<2x128xf32>
      %155 = vector.extract_strided_slice %0 {offsets = [3, 0], sizes = [1, 128], strides = [1, 1]} : vector<4x128xf32> to vector<1x128xf32>
      %156 = vector.broadcast %155 : vector<1x128xf32> to vector<2x128xf32>
      %157 = arith.addf %154, %156 : vector<2x128xf32>
      %cst_53 = arith.constant dense<0xFF800000> : vector<2xf32>
      %158 = vector.multi_reduction <maximumf>, %157, %cst_53 [1] : vector<2x128xf32> to vector<2xf32>
      %159 = vector.shape_cast %158 : vector<2xf32> to vector<2x1xf32>
      %160 = vector.broadcast %159 : vector<2x1xf32> to vector<2x128xf32>
      %161 = arith.subf %157, %160 : vector<2x128xf32>
      %162 = math.exp %161 : vector<2x128xf32>
      %cst_54 = arith.constant dense<0.000000e+00> : vector<2xf32>
      %163 = vector.multi_reduction <add>, %162, %cst_54 [1] : vector<2x128xf32> to vector<2xf32>
      %164 = vector.shape_cast %163 : vector<2xf32> to vector<2x1xf32>
      %165 = vector.broadcast %164 : vector<2x1xf32> to vector<2x128xf32>
      %166 = arith.divf %162, %165 : vector<2x128xf32>
      %c0_55 = arith.constant 0 : index
      %c0_56 = arith.constant 0 : index
      %167 = vector.load %arg11[%c0_55, %c0_56] : memref<2x128xf32, #tpu.memory_space<vmem>>, vector<2x128xf32>
      tpu.vector_store %arg11[%c0_55, %c0_56], %166 {strides = array<i32>} : memref<2x128xf32, #tpu.memory_space<vmem>>, vector<2x128xf32>,
    } else {
    }
    return
  }
  func.func @transform_0(%arg0: i32) -> (i32, i32, i32) {
    %c0_i32 = arith.constant 0 : i32
    %c0_i32_0 = arith.constant 0 : i32
    %c0_i32_1 = arith.constant 0 : i32
    %c0_i32_2 = arith.constant 0 : i32
    return %c0_i32, %c0_i32_0, %c0_i32_1 : i32, i32, i32
  }
  func.func @transform_1(%arg0: i32) -> (i32, i32) {
    %c0_i32 = arith.constant 0 : i32
    %c0_i32_0 = arith.constant 0 : i32
    %c0_i32_1 = arith.constant 0 : i32
    return %c0_i32, %c0_i32_0 : i32, i32
  }
  func.func @transform_2(%arg0: i32) -> (i32, i32) {
    %c0_i32 = arith.constant 0 : i32
    %c0_i32_0 = arith.constant 0 : i32
    %c0_i32_1 = arith.constant 0 : i32
    return %c0_i32, %c0_i32_0 : i32, i32
  }
  func.func @transform_3(%arg0: i32) -> (i32, i32, i32) {
    %c0_i32 = arith.constant 0 : i32
    %c0_i32_0 = arith.constant 0 : i32
    %c0_i32_1 = arith.constant 0 : i32
    return %arg0, %c0_i32, %c0_i32_0 : i32, i32, i32
  }
  func.func @transform_4(%arg0: i32) -> (i32, i32, i32) {
    %c0_i32 = arith.constant 0 : i32
    %c0_i32_0 = arith.constant 0 : i32
    %c0_i32_1 = arith.constant 0 : i32
    return %arg0, %c0_i32, %c0_i32_0 : i32, i32, i32
  }
  func.func @transform_5(%arg0: i32) -> (i32, i32, i32) {
    %c0_i32 = arith.constant 0 : i32
    %c0_i32_0 = arith.constant 0 : i32
    %c0_i32_1 = arith.constant 0 : i32
    return %arg0, %c0_i32, %c0_i32_0 : i32, i32, i32
  }
  func.func @transform_6(%arg0: i32) -> (i32, i32, i32) {
    %c0_i32 = arith.constant 0 : i32
    %c0_i32_0 = arith.constant 0 : i32
    %c0_i32_1 = arith.constant 0 : i32
    return %arg0, %c0_i32, %c0_i32_0 : i32, i32, i32
  }
  func.func @transform_7(%arg0: i32) -> (i32, i32, i32) {
    %c0_i32 = arith.constant 0 : i32
    %c0_i32_0 = arith.constant 0 : i32
    %c0_i32_1 = arith.constant 0 : i32
    return %arg0, %c0_i32, %c0_i32_0 : i32, i32, i32
  }
  func.func @transform_8(%arg0: i32) -> (i32, i32) {
    %c0_i32 = arith.constant 0 : i32
    %c0_i32_0 = arith.constant 0 : i32
    %c0_i32_1 = arith.constant 0 : i32
    return %c0_i32, %c0_i32_0 : i32, i32
  }
  func.func @transform_9(%arg0: i32) -> (i32, i32) {
    %c0_i32 = arith.constant 0 : i32
    %c0_i32_0 = arith.constant 0 : i32
    %c0_i32_1 = arith.constant 0 : i32
    return %c0_i32, %c0_i32_0 : i32, i32
  }
  func.func @transform_10(%arg0: i32) -> (i32, i32) {
    %c0_i32 = arith.constant 0 : i32
    %c0_i32_0 = arith.constant 0 : i32
    %c0_i32_1 = arith.constant 0 : i32
    return %c0_i32, %c0_i32_0 : i32, i32
  }
}

</mosaic_0001>

<bundles_post_ra>
// kernel: tpu_custom_call.1
= control target key start
LH: loop header
LB: loop body
LE: loop exit
PB: predicated region body
PF: predicated region fallthrough
CT: control target
= control target key end

     0   :  { %15 = vsyncpa [#allocation4], 0  ;;  %s3732_s0 = inlined_call_operand.vmem [shape: f32[2,8,32], index: 0, kind: input, shape index: {}]   ;;  %s3733_s1 = inlined_call_operand.hbm [shape: f32[2,8], index: 1, kind: input, shape index: {}]   ;;  %s3734_s2 = inlined_call_operand.hbm [shape: f32[4,128], index: 2, kind: input, shape index: {}]   ;;  %s3735_s3 = inlined_call_operand.vmem [shape: bf16[2,32,128], index: 3, kind: input, shape index: {}]   ;;  %s3736_s4 = inlined_call_operand.vmem [shape: bf16[2,32,32], index: 4, kind: input, shape index: {}]   ;;  %s3737_s5 = inlined_call_operand.vmem [shape: bf16[2,32,128], index: 5, kind: input, shape index: {}]   ;;  %s3738_s6 = inlined_call_operand.vmem [shape: bf16[2,128,32], index: 6, kind: input, shape index: {}]   ;;  %s3739_s7 = inlined_call_operand.vmem [shape: f32[2,8,128], index: 7, kind: input, shape index: {}]   ;;  %s3740_s8 = inlined_call_operand.vmem [shape: bf16[32,32], index: 8, kind: input, shape index: {}]   ;;  %s3741_s9 = inlined_call_operand.vmem [shape: bf16[32,128], index: 9, kind: input, shape index: {}]   ;;  %s3742_s10 = inlined_call_operand.hbm [shape: f32[2,128], index: 10, kind: output, shape index: {}]  }
   0x1   :  { %16 = vsyncpa [#allocation7], 0 }
   0x2   :  { %17 = vsyncpa [#allocation5], 0  ;;  %s3368_s13 = smov 0  }
   0x3 LB: > { %s3374_s14 = sadd.s32 4294967295, %s3303_s13   ;;  %p2715_p0 = scmp.ge.s32.totalorder %s3303_s13, 1  ;;  %s3303_s13 = sphi %s3368_s13, %s23_s13  }
   0x4   : > { %p284_p1 = scmp.lt.s32.totalorder %s3303_s13, 3  ;;  %p3743_p3 = scmp.eq.s32.totalorder %s3374_s14, 0 }
   0x5   : > { %s3305_s16 = smov [#allocation3]   ;;  %s3306_s18 = smov [#allocation6]  }
   0x6   : > { %p3380_p4 = pnand %p2715_p0, %p284_p1  ;;  %s300_s17 = sshll.u32 %s3305_s16, 4  ;;  %s301_s17 = int_to_ptr.vmem [resolvable:$true] %s300_s17 }
   0x7   : > { %s311_s19 = sshll.u32 %s3306_s18, 4  ;;  %s3220_s21 = scalar_lea.vmem %s301_s17, 32  ;;  %s312_s19 = int_to_ptr.vmem [resolvable:$true] %s311_s19 }
   0x8   : > { %s3745_s15 = scalar_select %p3380_p4, 1, 0 }
   0x9   : > { %p3004_p5 = pneg %p3380_p4  ;;  %p3221_p8 = scmp.ne.s32.totalorder %s301_s17, %s3220_s21 }
   0xa   : > { %p3228_p11 = scmp.lt.s32.totalorder %s301_s17, %s301_s17  ;;  %p3229_p12 = scmp.lt.s32.totalorder %s3220_s21, %s3220_s21 }
   0xb   : > { %p3388_p6 = pnand %p3743_p3, %p3004_p5 }
   0xc   : > { %p3230_p13 = por %p3229_p12, %p3228_p11 }
   0xd   : > { %p3211_p7 = pneg %p3388_p6 }
   0xf   : > { %p3223_p9 = pnand %p3221_p8, %p3211_p7 }
  0x11   : > { %p3224_p10 = pneg %p3223_p9 }
  0x13   : > { %p3231_p0 = pnand %p3230_p13, %p3224_p10 }
  0x15   : > { %3234 = shalt.err (!%p3231_p0)
}
  0x16   : > { %3007 = dma.hbm_to_vmem [thread:$0]  (!%p3388_p6), %s3733_s1, 32, %s301_s17, [#allocation4]  }
  0x17   : > { %s3246_s24 = scalar_lea.vmem %s312_s19, 64  ;;  %p3254_p8 = scmp.lt.s32.totalorder %s312_s19, %s312_s19 }
  0x18   : > { %p3247_p1 = scmp.ne.s32.totalorder %s312_s19, %s3246_s24  ;;  %p3255_p9 = scmp.lt.s32.totalorder %s3246_s24, %s3246_s24 }
  0x1a   : > { %p3249_p5 = pnand %p3247_p1, %p3211_p7  ;;  %p3256_p3 = por %p3255_p9, %p3254_p8 }
  0x1c   : > { %p3250_p2 = pneg %p3249_p5 }
  0x1e   : > { %p3257_p4 = pnand %p3256_p3, %p3250_p2 }
  0x20   : > { %3260 = shalt.err (!%p3257_p4)
}
  0x21   : > { %3010 = dma.hbm_to_vmem [thread:$0]  (!%p3388_p6), %s3734_s2, 64, %s312_s19, [#allocation7]  }
  0x22   : > { %p3747_p10 = scmp.ne.s32.totalorder %s3745_s15, 0 }
  0x23   : > { %p3748_p11 = scmp.eq.s32.totalorder (!%p3747_p10), %s3374_s14, 0 }
  0x24   : > { %369 = sbr.rel (%p3747_p10) target bundleno = 3810 (0xee2), region = 60 }
  0x29   : > { %3290 = dma.done.wait (%p3748_p11), [#allocation4], 32   ;;  %p3749_p7 = pmov %p3748_p11 }
  0x2b   : > { %3292 = vsyncadd (%p3749_p7), [#allocation4], 4294967264  ;;  %p3750_p12 = pmov %p3749_p7 }
  0x2c   : > { %p3751_p2 = pmov %p3749_p7 }
  0x2d   : > { %3294 = dma.done.wait (%p3750_p12), [#allocation7], 64  }
  0x2e   : > { %3296 = vsyncadd (%p3751_p2), [#allocation7], 4294967232  ;;  %p425_p3 = scmp.lt.s32.totalorder %s3374_s14, 1  ;;  %v3442_v0 = vld [vmem:[#allocation6] sm:$0xf]  ;;  %p3752_p4 = scmp.ne.s32.totalorder %s3374_s14, 0 }
  0x30   : > { %s426_s27 = scalar_select %p425_p3, %s3374_s14, 1 }
  0x32   : > { %s2776_s28 = sshll.u32 %s426_s27, 4  ;;  %s2779_s29 = sshll.u32 %s426_s27, 6 }
  0x33   : > { %s3425_s12 = scalar_lea.vmem %s3735_s3, %s2776_s28  ;;  %s3430_s17 = scalar_lea.vmem %s3736_s4, %s2776_s28 }
  0x34   : > { %s3435_s20 = scalar_lea.vmem %s3737_s5, %s2776_s28  ;;  %s3440_s23 = scalar_lea.vmem %s3738_s6, %s2779_s29 }
  0x35   : > { %s2730_s24 = sshll.u32 %s426_s27, 3  ;;  %454 = sbr.rel (%p3752_p4) target bundleno = 372 (0x174), region = 72 }
  0x36   : > { %s3447_s30 = scalar_lea.vmem %s3739_s7, %s2730_s24 }
  0x3a   : > { %v455_v1 = vld [vmem:[%s3732_s0] sm:$0xff]  ;;  %vm457_vm0 = vcmask 261120   ;;  %v456_v2 = vld [vmem:[%s3732_s0 + $0x8] sm:$0xff]  ;;  %v485_v19 = vlaneseq }
  0x3b   : > { %v458_v3 = vsel %vm457_vm0, %v455_v1, 0.0  ;;  %v461_v4 = vsel %vm457_vm0, %v456_v2, 0.0 }
  0x3c   : > { %459 = vadd.xlane.f32.xlu0 %v458_v3  ;;  %v486_v22 = vshrl.u32 %v485_v19, 7 }
  0x3e   : > { %v487_v23 = vsub.s32 0, %v486_v22  ;;  %v493_v24 = vsub.s32 1, %v486_v22 }
  0x40   : > { %462 = vadd.xlane.f32.xlu0 %v461_v4  ;;  %v488_v25 = vrot.slane %v3442_v0, %v487_v23  ;;  %v494_v27 = vrot.slane %v3442_v0, %v493_v24 }
  0xc5   : > { %v460_v5 = vpop.xlane.xlu0 %459 }
  0xc6   : > { %v465_v6 = vmul.f32 0.03125, %v460_v5 }
  0xc8   : > { %v467_v7 = vsub.f32 %v455_v1, %v465_v6 }
  0xc9   : > { %v463_v8 = vpop.xlane.xlu0 %462 }
  0xca   : > { %v466_v9 = vmul.f32 0.03125, %v463_v8  ;;  %v469_v10 = vmul.f32 %v467_v7, %v467_v7 }
  0xcc   : > { %v468_v11 = vsub.f32 %v456_v2, %v466_v9  ;;  %v471_v12 = vsel %vm457_vm0, %v469_v10, 0.0 }
  0xcd   : > { %472 = vadd.xlane.f32.xlu1 %v471_v12 }
  0xce   : > { %v470_v13 = vmul.f32 %v468_v11, %v468_v11 }
  0xd0   : > { %v474_v14 = vsel %vm457_vm0, %v470_v13, 0.0 }
  0xd1   : > { %475 = vadd.xlane.f32.xlu1 %v474_v14 }
 0x156   : > { %v473_v15 = vpop.xlane.xlu1 %472 }
 0x157   : > { %v477_v16 = vmul.f32 0.03125, %v473_v15 }
 0x159   : > { %v479_v17 = vadd.f32 1e-12, %v477_v16 }
 0x15a   : > { %v476_v18 = vpop.xlane.xlu1 %475 }
 0x15b   : > { %3033 = vrsqrt.f32 %v479_v17  ;;  %v478_v20 = vmul.f32 0.03125, %v476_v18 }
 0x15d   : > { %v480_v21 = vadd.f32 1e-12, %v478_v20 }
 0x15f   : > { %3035 = vrsqrt.f32 %v480_v21 }
 0x168   : > { %v3034_v26 = vpop.eup %3033 }
 0x169   : > { %v483_v28 = vmul.f32 %v3034_v26, %v467_v7 }
 0x16b   : > { %v489_v29 = vmul.f32 %v488_v25, %v483_v28 }
 0x16c   : > { %v3036_v30 = vpop.eup %3035 }
 0x16d   : > { %v495_v31 = vadd.f32 %v494_v27, %v489_v29  ;;  %v484_v32 = vmul.f32 %v3036_v30, %v468_v11 }
 0x16f   : > { %497 = vst.msk [vmem:[#allocation2] sm:$0xff] %vm457_vm0, %v495_v31  ;;  %v490_v33 = vmul.f32 %v488_v25, %v484_v32 }
 0x171   : > { %v496_v34 = vadd.f32 %v494_v27, %v490_v33 }
 0x173   : > { %498 = vst.msk [vmem:[#allocation2 + $0x8] sm:$0xff] %vm457_vm0, %v496_v34 }
 0x174 PF: > { %v3140_v35 = vld [vmem:[%s3425_s12 + $0x8] sm:$0xff]   ;;  %v3307_v36 = vmov 0.0   ;;  %v3141_v37 = vld [vmem:[%s3425_s12] sm:$0xff]   ;;  %vm3308_vm1 = vmmov 0   ;;  %vm549_vm2 = vcmask 261120   ;;  %v510_v41 = vlaneseq  ;;  %p2765_p6 = scmp.ne.s32.totalorder %s3374_s14, 1 }
 0x175   : > { %2836 = vmatprep.subr.bf16.mxu1 %v3307_v36  ;;  %2856 = vmatprep.subr.bf16.mxu0 %v3307_v36  ;;  %v3490_v44 = vld [vmem:[%s3447_s30] sm:$0xff]  ;;  %vm952_vm3 = vcmask 1043456   ;;  %vm948_vm4 = vcmask 64512  }
 0x176   : > { %2837 = vmatpush3.bf16.msra.mxu1 %v3140_v35  ;;  %2840 = vmatprep.mubr.msk.bf16.mxu1 %vm3308_vm1, %v3307_v36  ;;  %v3471_v38 = vld [vmem:[#allocation2] sm:$0xff]  ;;  %v3484_v42 = vshrl.u32 %v510_v41, 7 }
 0x177   : > { %2838 = vmatprep.subr.bf16.mxu1 %v3307_v36  ;;  %2858 = vmatprep.mubr.msk.bf16.mxu0 %vm3308_vm1, %v3307_v36 }
 0x178   : > { %v3487_v43 = vsub.s32 0, %v3484_v42 }
 0x17a   : > { %v3473_v39 = vld [vmem:[#allocation2 + $0x8] sm:$0xff]  ;;  %2839 = vmatpush3.bf16.msra.mxu1 %v3141_v37  ;;  %v536_v46 = vrot.slane %v3490_v44, %v3487_v43 }
 0x17b   : > { %v502_v40 = vpack.c.bf16 %v3473_v39, %v3471_v38  ;;  %2844 = vmatprep.subr.bf16.mxu1 %v3307_v36 }
 0x17d   : > { %2841 = vmatmul.mubr.msk.bf16.vlgmr.msra.gmra.mxu1 %vm549_vm2, %v502_v40 }
 0x17e   : > { %2846 = vmatprep.mubr.msk.bf16.mxu1 %vm3308_vm1, %v3307_v36 }
 0x23d   : > { %v587_v45 = vpop.f32.mrf.mxu1 }
 0x23e   : > { %v588_v49 = vadd.f32 %v587_v45, %v536_v46 }
 0x23f   : > { %v2842_v47 = vpop.f32.mrf.mxu1 }
 0x241   : > { %v590_v48 = vpop.f32.mrf.mxu1 }
 0x242   : > { %v591_v50 = vadd.f32 %v590_v48, %v536_v46 }
 0x243   : > { %v2843_v51 = vpop.f32.mrf.mxu1 }
 0x244   : > { %v3037_v52 = vpack.i.bf16 %v591_v50, %v588_v49 }
 0x246   : > { %3038 = vxpose.xlu0.b32.start.end [1/1] (short) (narrow) %v3037_v52, 96 }
 0x2c2   : > { %v3039_v53 = vpop.trf.xlu0 }
 0x2c3   : > { %v3040_v54 = vunpack.i.l.bf16 %v3039_v53  ;;  %v3043_v61 = vunpack.i.h.bf16 %v3039_v53 }
 0x2c5   : > { %658 = vxpose.xlu0.b32.start.end [1/1] (short) (narrow) %v3040_v54, 8 }
 0x2c6   : > { %v3044_v55 = vpop.trf.xlu0 }
 0x2c7   : > { %v3045_v56 = vunpack.i.l.bf16 %v3044_v55  ;;  %v3048_v4 = vunpack.i.h.bf16 %v3044_v55 }
 0x2c9   : > { %690 = vxpose.xlu1.b32.start.end [1/1] (short) (narrow) %v3045_v56, 8 }
 0x2ca   : > { %v3049_v57 = vpop.trf.xlu0 }
 0x2cb   : > { %v3050_v58 = vunpack.i.l.bf16 %v3049_v57  ;;  %v3053_v12 = vunpack.i.h.bf16 %v3049_v57 }
 0x2cd   : > { %722 = vxpose.xlu1.b32.start.end [1/1] (short) (narrow) %v3050_v58, 8 }
 0x2ce   : > { %v3054_v59 = vpop.trf.xlu0 }
 0x2cf   : > { %v3055_v60 = vunpack.i.l.bf16 %v3054_v59  ;;  %v3058_v20 = vunpack.i.h.bf16 %v3054_v59 }
 0x2d1   : > { %754 = vxpose.xlu1.b32.start.end [1/1] (short) (narrow) %v3055_v60, 8 }
 0x2d2   : > { %v3059_v62 = vpop.trf.xlu0 }
 0x2d3   : > { %v3063_v63 = vunpack.i.h.bf16 %v3059_v62  ;;  %v3060_v1 = vunpack.i.l.bf16 %v3059_v62  ;;  %v3309_v62 = vmov 1966171168  }
 0x2d5   : > { %786 = vxpose.xlu1.b32.start.end [1/1] (short) (narrow) %v3043_v61, 8  ;;  %v922_v2 = vpack.c.bf16 %v3060_v1, %v3060_v1  ;;  %v926_v3 = vpack.c.bf16 %v3063_v63, %v3063_v63  ;;  %v508_v63 = vunpack.c.l.s4 %v3309_v62  ;;  %v503_v1 = vld [vmem:[#allocation3] sm:$0x3] }
 0x2d6   : > { %v3064_v5 = vpop.trf.xlu0 }
 0x2d7   : > { %v3068_v6 = vunpack.i.h.bf16 %v3064_v5  ;;  %v3065_v7 = vunpack.i.l.bf16 %v3064_v5  ;;  %v954_v8 = vsel %vm952_vm3, %v922_v2, 0  ;;  %v1138_v9 = vsel %vm952_vm3, %v926_v3, 0 }
 0x2d8   : > { %2845 = vmatpush3.bf16.msra.mxu1 %v954_v8  ;;  %v504_v2 = vsub.f32 1.0, %v503_v1  ;;  %v509_v3 = vunpack.c.0.s8 %v508_v63 }
 0x2d9   : > { %818 = vxpose.xlu1.b32.start.end [1/1] (short) (narrow) %v3048_v4, 8  ;;  %v923_v10 = vpack.c.bf16 %v3065_v7, %v3065_v7  ;;  %v927_v11 = vpack.c.bf16 %v3068_v6, %v3068_v6  ;;  %2850 = vmatprep.subr.bf16.mxu1 %v3307_v36 }
 0x2da   : > { %v3069_v13 = vpop.trf.xlu0  ;;  %v505_v4 = vmul.f32 -1e+09, %v504_v2  ;;  %v512_v5 = vsub.s32 %v509_v3, %v3484_v42 }
 0x2db   : > { %v3073_v14 = vunpack.i.h.bf16 %v3069_v13  ;;  %v3070_v15 = vunpack.i.l.bf16 %v3069_v13  ;;  %v1000_v16 = vsel %vm952_vm3, %v923_v10, 0  ;;  %v1184_v17 = vsel %vm952_vm3, %v927_v11, 0 }
 0x2dc   : > { %v513_v6 = vrot.slane %v505_v4, %v512_v5 }
 0x2dd   : > { %850 = vxpose.xlu1.b32.start.end [1/1] (short) (narrow) %v3053_v12, 8  ;;  %v924_v18 = vpack.c.bf16 %v3070_v15, %v3070_v15  ;;  %v928_v19 = vpack.c.bf16 %v3073_v14, %v3073_v14 }
 0x2de   : > { %v3074_v21 = vpop.trf.xlu0  ;;  %v521_v7 = vrot.slane %v513_v6, %v512_v5  ;;  %v514_v14 = vcombine.high %v513_v6, %v513_v6 }
 0x2df   : > { %v3078_v22 = vunpack.i.h.bf16 %v3074_v21  ;;  %v3075_v23 = vunpack.i.l.bf16 %v3074_v21  ;;  %v1046_v24 = vsel %vm952_vm3, %v924_v18, 0  ;;  %v1230_v25 = vsel %vm952_vm3, %v928_v19, 0 }
 0x2e0   : > { %2857 = vmatpush3.bf16.msra.mxu0 %v1046_v24  ;;  %v941_v8 = vrot.slane %v521_v7, %v3487_v43 }
 0x2e1   : > { %882 = vxpose.xlu1.b32.start.end [1/1] (short) (narrow) %v3058_v20, 8  ;;  %v925_v26 = vpack.c.bf16 %v3075_v23, %v3075_v23  ;;  %v929_v27 = vpack.c.bf16 %v3078_v22, %v3078_v22  ;;  %2868 = vmatprep.subr.bf16.mxu0 %v3307_v36  ;;  %v528_v20 = vrot.slane %v514_v14, %v512_v5 }
 0x2e2   : > { %v3501_v28 = vpop.trf.xlu0 }
 0x2e3   : > { %v1092_v29 = vsel %vm952_vm3, %v925_v26, 0  ;;  %v1276_v30 = vsel %vm952_vm3, %v929_v27, 0  ;;  %v3080_v50 = vunpack.i.l.bf16 %v3501_v28  ;;  %v945_v27 = vrot.slane %v528_v20, %v3487_v43 }
 0x2e5   : > { %v930_v53 = vpack.c.bf16 %v3080_v50, %v3080_v50 }
 0x2e6   : > { %v3506_v31 = vpop.trf.xlu0 }
 0x2e7   : > { %v3085_v56 = vunpack.i.l.bf16 %v3506_v31  ;;  %v1418_v57 = vsel %vm948_vm4, %v930_v53, 0 }
 0x2e9   : > { %v931_v60 = vpack.c.bf16 %v3085_v56, %v3085_v56 }
 0x2ea   : > { %v3508_v32 = vpop.trf.xlu0 }
 0x2eb   : > { %v1464_v61 = vsel %vm948_vm4, %v931_v60, 0 }
 0x2ee   : > { %v3510_v33 = vpop.trf.xlu0 }
 0x341   : > { %v674_v34 = vpop.trf.xlu0 }
 0x342   : > { %v914_v35 = vpack.c.bf16 %v674_v34, %v674_v34 }
 0x344   : > { %2847 = vmatmul.mubr.msk.bf16.vlgmr.msra.gmra.mxu1 %vm948_vm4, %v914_v35 }
 0x345   : > { %2851 = vmatpush3.bf16.msra.mxu1 %v1000_v16  ;;  %v706_v37 = vpop.trf.xlu1  ;;  %2852 = vmatprep.mubr.msk.bf16.mxu1 %vm3308_vm1, %v3307_v36 }
 0x346   : > { %2862 = vmatprep.subr.bf16.mxu1 %v3307_v36  ;;  %v915_v40 = vpack.c.bf16 %v706_v37, %v706_v37 }
 0x349   : > { %v738_v41 = vpop.trf.xlu1 }
 0x34a   : > { %v916_v45 = vpack.c.bf16 %v738_v41, %v738_v41 }
 0x34c   : > { %2853 = vmatmul.mubr.msk.bf16.vlgmr.msra.gmra.mxu1 %vm948_vm4, %v915_v40  ;;  %2859 = vmatmul.mubr.msk.bf16.vlgmr.msra.gmra.mxu0 %vm948_vm4, %v916_v45 }
 0x34d   : > { %2863 = vmatpush3.bf16.msra.mxu1 %v1092_v29  ;;  %2869 = vmatpush3.bf16.msra.mxu0 %v1138_v9  ;;  %v770_v46 = vpop.trf.xlu1 }
 0x34e   : > { %2864 = vmatprep.mubr.msk.bf16.mxu1 %vm3308_vm1, %v3307_v36  ;;  %2870 = vmatprep.mubr.msk.bf16.mxu0 %vm3308_vm1, %v3307_v36  ;;  %v917_v47 = vpack.c.bf16 %v770_v46, %v770_v46 }
 0x34f   : > { %2874 = vmatprep.subr.bf16.mxu1 %v3307_v36  ;;  %2880 = vmatprep.subr.bf16.mxu0 %v3307_v36 }
 0x351   : > { %v802_v48 = vpop.trf.xlu1 }
 0x352   : > { %v918_v49 = vpack.c.bf16 %v802_v48, %v802_v48 }
 0x354   : > { %2865 = vmatmul.mubr.msk.bf16.vlgmr.msra.gmra.mxu1 %vm948_vm4, %v917_v47  ;;  %2871 = vmatmul.mubr.msk.bf16.vlgmr.msra.gmra.mxu0 %vm948_vm4, %v918_v49 }
 0x355   : > { %2875 = vmatpush3.bf16.msra.mxu1 %v1184_v17  ;;  %2881 = vmatpush3.bf16.msra.mxu0 %v1230_v25  ;;  %v834_v51 = vpop.trf.xlu1 }
 0x356   : > { %2876 = vmatprep.mubr.msk.bf16.mxu1 %vm3308_vm1, %v3307_v36  ;;  %2882 = vmatprep.mubr.msk.bf16.mxu0 %vm3308_vm1, %v3307_v36  ;;  %v919_v52 = vpack.c.bf16 %v834_v51, %v834_v51 }
 0x357   : > { %2886 = vmatprep.subr.bf16.mxu1 %v3307_v36  ;;  %2892 = vmatprep.subr.bf16.mxu0 %v3307_v36 }
 0x359   : > { %v866_v54 = vpop.trf.xlu1 }
 0x35a   : > { %v920_v55 = vpack.c.bf16 %v866_v54, %v866_v54 }
 0x35c   : > { %2877 = vmatmul.mubr.msk.bf16.vlgmr.msra.gmra.mxu1 %vm948_vm4, %v919_v52  ;;  %2883 = vmatmul.mubr.msk.bf16.vlgmr.msra.gmra.mxu0 %vm948_vm4, %v920_v55 }
 0x35d   : > { %2887 = vmatpush3.bf16.msra.mxu1 %v1276_v30  ;;  %2893 = vmatpush3.bf16.xpose.msra.mxu0 %v1418_v57  ;;  %v898_v58 = vpop.trf.xlu1 }
 0x35e   : > { %2888 = vmatprep.mubr.msk.bf16.mxu1 %vm3308_vm1, %v3307_v36  ;;  %2898 = vmatprep.subr.bf16.mxu1 %v3307_v36  ;;  %v921_v59 = vpack.c.bf16 %v898_v58, %v898_v58 }
 0x35f   : > { %2894 = vmatprep.mubr.msk.bf16.mxu0 %vm3308_vm1, %v3307_v36  ;;  %2904 = vmatprep.subr.bf16.mxu0 %v3307_v36 }
 0x364   : > { %2889 = vmatmul.mubr.msk.bf16.vlgmr.msra.gmra.mxu1 %vm948_vm4, %v921_v59 }
 0x365   : > { %2899 = vmatpush3.bf16.xpose.msra.mxu1 %v1464_v61  ;;  %2900 = vmatprep.mubr.msk.bf16.mxu1 %vm3308_vm1, %v3307_v36 }
 0x366   : > { %2910 = vmatprep.subr.bf16.mxu1 %v3307_v36 }
 0x404   : > { %v990_v9 = vpop.f32.mrf.mxu1 }
 0x405   : > { %v991_v10 = vadd.f32 %v990_v9, %v941_v8 }
 0x406   : > { %v2848_v11 = vpop.f32.mrf.mxu1 }
 0x407   : > { %v1318_v12 = vsel %vm948_vm4, %v991_v10, -inf }
 0x408   : > { %1319 = vmax.xlane.f32.xlu1 %v1318_v12  ;;  %v993_v13 = vpop.f32.mrf.mxu1 }
 0x40a   : > { %v2849_v15 = vpop.f32.mrf.mxu1 }
 0x40c   : > { %v1036_v16 = vpop.f32.mrf.mxu1  ;;  %v1082_v17 = vpop.f32.mrf.mxu0 }
 0x40d   : > { %v1037_v18 = vadd.f32 %v1036_v16, %v941_v8  ;;  %v1083_v19 = vadd.f32 %v1082_v17, %v941_v8 }
 0x40e   : > { %v2854_v21 = vpop.f32.mrf.mxu1  ;;  %v2860_v22 = vpop.f32.mrf.mxu0 }
 0x40f   : > { %v1324_v23 = vsel %vm948_vm4, %v1083_v19, -inf  ;;  %v1321_v24 = vsel %vm948_vm4, %v1037_v18, -inf }
 0x410   : > { %v1085_v25 = vpop.f32.mrf.mxu0  ;;  %1325 = vmax.xlane.f32.xlu1 %v1324_v23  ;;  %1322 = vmax.xlane.f32.xlu0 %v1321_v24  ;;  %v1039_v26 = vpop.f32.mrf.mxu1 }
 0x412   : > { %v2855_v29 = vpop.f32.mrf.mxu1  ;;  %v2861_v30 = vpop.f32.mrf.mxu0 }
 0x414   : > { %v1128_v34 = vpop.f32.mrf.mxu1  ;;  %v1174_v35 = vpop.f32.mrf.mxu0 }
 0x415   : > { %v1129_v37 = vadd.f32 %v1128_v34, %v941_v8  ;;  %v1175_v40 = vadd.f32 %v1174_v35, %v945_v27 }
 0x416   : > { %v2866_v41 = vpop.f32.mrf.mxu1  ;;  %v2872_v45 = vpop.f32.mrf.mxu0 }
 0x417   : > { %v1327_v46 = vsel %vm948_vm4, %v1129_v37, -inf  ;;  %v1330_v49 = vsel %vm948_vm4, %v1175_v40, -inf }
 0x418   : > { %v1177_v47 = vpop.f32.mrf.mxu0  ;;  %1328 = vmax.xlane.f32.xlu1 %v1327_v46  ;;  %v1131_v48 = vpop.f32.mrf.mxu1 }
 0x41a   : > { %v2867_v50 = vpop.f32.mrf.mxu1  ;;  %v2873_v51 = vpop.f32.mrf.mxu0 }
 0x41c   : > { %v1266_v52 = vpop.f32.mrf.mxu0  ;;  %1331 = vmax.xlane.f32.xlu1 %v1330_v49  ;;  %v1220_v43 = vpop.f32.mrf.mxu1 }
 0x41d   : > { %v1267_v53 = vadd.f32 %v1266_v52, %v945_v27  ;;  %v1221_v54 = vadd.f32 %v1220_v43, %v945_v27 }
 0x41e   : > { %v2878_v55 = vpop.f32.mrf.mxu1  ;;  %v2884_v56 = vpop.f32.mrf.mxu0 }
 0x41f   : > { %v1333_v57 = vsel %vm948_vm4, %v1221_v54, -inf  ;;  %v1336_v60 = vsel %vm948_vm4, %v1267_v53, -inf }
 0x420   : > { %v1269_v58 = vpop.f32.mrf.mxu0  ;;  %1334 = vmax.xlane.f32.xlu1 %v1333_v57  ;;  %v1223_v59 = vpop.f32.mrf.mxu1 }
 0x421   : > { %v3090_v58 = vunpack.i.l.bf16 %v3508_v32 }
 0x422   : > { %v2879_v61 = vpop.f32.mrf.mxu1  ;;  %v2885_v62 = vpop.f32.mrf.mxu0 }
 0x423   : > { %v932_v61 = vpack.c.bf16 %v3090_v58, %v3090_v58 }
 0x424   : > { %1337 = vmax.xlane.f32.xlu1 %v1336_v60  ;;  %v1312_v63 = vpop.f32.mrf.mxu1 }
 0x425   : > { %v1313_v1 = vadd.f32 %v1312_v63, %v945_v27 }
 0x426   : > { %v2890_v2 = vpop.f32.mrf.mxu1 }
 0x427   : > { %v1339_v3 = vsel %vm948_vm4, %v1313_v1, -inf  ;;  %v1510_v2 = vsel %vm948_vm4, %v932_v61, 0 }
 0x428   : > { %1340 = vmax.xlane.f32.xlu1 %v1339_v3  ;;  %v1315_v4 = vpop.f32.mrf.mxu1  ;;  %v3095_v3 = vunpack.i.l.bf16 %v3510_v33 }
 0x42a   : > { %v2891_v5 = vpop.f32.mrf.mxu1 }
 0x491   : > { %v1320_v6 = vpop.xlane.xlu1 %1319 }
 0x492   : > { %v1342_v7 = vsub.f32 %v991_v10, %v1320_v6 }
 0x494   : > { %v1350_v8 = vmul.f32 1.442695, %v1342_v7 }
 0x496   : > { %3154 = vpow2.f32 %v1350_v8 }
 0x499   : > { %v1326_v9 = vpop.xlane.xlu1 %1325  ;;  %v1323_v11 = vpop.xlane.xlu0 %1322 }
 0x49a   : > { %v1344_v12 = vsub.f32 %v1083_v19, %v1326_v9  ;;  %v1343_v13 = vsub.f32 %v1037_v18, %v1323_v11  ;;  %v933_v11 = vpack.c.bf16 %v3095_v3, %v3095_v3 }
 0x49c   : > { %v1354_v14 = vmul.f32 1.442695, %v1344_v12  ;;  %v1352_v15 = vmul.f32 1.442695, %v1343_v13 }
 0x49e   : > { %3156 = vpow2.f32 %v1354_v14 }
 0x49f   : > { %3158 = vpow2.f32 %v1352_v15  ;;  %v3088_v15 = vunpack.i.h.bf16 %v3506_v31 }
 0x4a1   : > { %v1329_v16 = vpop.xlane.xlu1 %1328 }
 0x4a2   : > { %v1345_v17 = vsub.f32 %v1129_v37, %v1329_v16  ;;  %v1556_v16 = vsel %vm948_vm4, %v933_v11, 0 }
 0x4a3   : > { %v3155_v20 = vpop.eup %3154 }
 0x4a4   : > { %v1356_v21 = vmul.f32 1.442695, %v1345_v17  ;;  %v1366_v22 = vsel %vm948_vm4, %v3155_v20, 0.0 }
 0x4a5   : > { %v1332_v23 = vpop.xlane.xlu1 %1331  ;;  %1367 = vadd.xlane.f32.xlu1 %v1366_v22 }
 0x4a6   : > { %3160 = vpow2.f32 %v1356_v21  ;;  %v1346_v10 = vsub.f32 %v1175_v40, %v1332_v23  ;;  %v3093_v21 = vunpack.i.h.bf16 %v3508_v32  ;;  %v935_v23 = vpack.c.bf16 %v3088_v15, %v3088_v15 }
 0x4a8   : > { %v1358_v24 = vmul.f32 1.442695, %v1346_v10 }
 0x4a9   : > { %v1335_v25 = vpop.xlane.xlu1 %1334 }
 0x4aa   : > { %3162 = vpow2.f32 %v1358_v24  ;;  %v1347_v26 = vsub.f32 %v1221_v54, %v1335_v25 }
 0x4ab   : > { %v3157_v19 = vpop.eup %3156 }
 0x4ac   : > { %v3159_v18 = vpop.eup %3158  ;;  %v1360_v27 = vmul.f32 1.442695, %v1347_v26  ;;  %v1372_v29 = vsel %vm948_vm4, %v3157_v19, 0.0  ;;  %v936_v26 = vpack.c.bf16 %v3093_v21, %v3093_v21  ;;  %v3142_v21 = vld [vmem:[%s3430_s17 + $0x8] sm:$0xff]  }
 0x4ad   : > { %v1369_v30 = vsel %vm948_vm4, %v3159_v18, 0.0  ;;  %v1338_v34 = vpop.xlane.xlu1 %1337  ;;  %1373 = vadd.xlane.f32.xlu1 %v1372_v29 }
 0x4ae   : > { %3164 = vpow2.f32 %v1360_v27  ;;  %1370 = vadd.xlane.f32.xlu0 %v1369_v30  ;;  %v1348_v35 = vsub.f32 %v1267_v53, %v1338_v34  ;;  %v1694_v29 = vsel %vm948_vm4, %v936_v26, 0 }
 0x4b0   : > { %v1362_v37 = vmul.f32 1.442695, %v1348_v35 }
 0x4b1   : > { %v1341_v41 = vpop.xlane.xlu1 %1340 }
 0x4b2   : > { %3166 = vpow2.f32 %v1362_v37  ;;  %v1349_v40 = vsub.f32 %v1313_v1, %v1341_v41  ;;  %v3083_v1 = vunpack.i.h.bf16 %v3501_v28 }
 0x4b3   : > { %v3562_v45 = vpop.eup %3160 }
 0x4b4   : > { %v1364_v46 = vmul.f32 1.442695, %v1349_v40  ;;  %v1375_v47 = vsel %vm948_vm4, %v3562_v45, 0.0  ;;  %v934_v8 = vpack.c.bf16 %v3083_v1, %v3083_v1 }
 0x4b5   : > { %1376 = vadd.xlane.f32.xlu0 %v1375_v47 }
 0x4b6   : > { %3168 = vpow2.f32 %v1364_v46  ;;  %v1602_v14 = vsel %vm948_vm4, %v934_v8, 0 }
 0x4b7   : > { %v3566_v48 = vpop.eup %3162 }
 0x4b8   : > { %v1378_v49 = vsel %vm948_vm4, %v3566_v48, 0.0 }
 0x4b9   : > { %1379 = vadd.xlane.f32.xlu1 %v1378_v49 }
 0x4bb   : > { %v3570_v50 = vpop.eup %3164 }
 0x4bc   : > { %v1381_v51 = vsel %vm948_vm4, %v3570_v50, 0.0 }
 0x4bd   : > { %1382 = vadd.xlane.f32.xlu0 %v1381_v51 }
 0x4bf   : > { %v3574_v52 = vpop.eup %3166 }
 0x4c0   : > { %v1384_v43 = vsel %vm948_vm4, %v3574_v52, 0.0 }
 0x4c1   : > { %1385 = vadd.xlane.f32.xlu1 %v1384_v43 }
 0x4c3   : > { %v3578_v53 = vpop.eup %3168 }
 0x4c4   : > { %v1387_v54 = vsel %vm948_vm4, %v3578_v53, 0.0 }
 0x4c5   : > { %1388 = vadd.xlane.f32.xlu0 %v1387_v54 }
 0x52e   : > { %v1368_v55 = vpop.xlane.xlu1 %1367 }
 0x52f   : > { %3170 = vrcp.f32 %v1368_v55 }
 0x536   : > { %v1374_v56 = vpop.xlane.xlu1 %1373 }
 0x537   : > { %v1371_v57 = vpop.xlane.xlu0 %1370  ;;  %3172 = vrcp.f32 %v1374_v56 }
 0x538   : > { %3174 = vrcp.f32 %v1371_v57 }
 0x53c   : > { %v3171_v59 = vpop.eup %3170 }
 0x53d   : > { %v1398_v60 = vmul.f32 %v3171_v59, %v3155_v20 }
 0x53e   : > { %v1377_v62 = vpop.xlane.xlu0 %1376 }
 0x53f   : > { %3176 = vrcp.f32 %v1377_v62  ;;  %v1406_v63 = vpack.c.bf16 %v1398_v60, %v1398_v60 }
 0x541   : > { %2895 = vmatmul.mubr.msk.bf16.vlgmr.msra.gmra.mxu0 %vm948_vm4, %v1406_v63 }
 0x542   : > { %2905 = vmatpush3.bf16.xpose.msra.mxu0 %v1510_v2  ;;  %v1380_v4 = vpop.xlane.xlu1 %1379  ;;  %2906 = vmatprep.mubr.msk.bf16.mxu0 %vm3308_vm1, %v3307_v36 }
 0x543   : > { %3178 = vrcp.f32 %v1380_v4  ;;  %2916 = vmatprep.subr.bf16.mxu0 %v3307_v36 }
 0x544   : > { %v3173_v5 = vpop.eup %3172 }
 0x545   : > { %v3175_v6 = vpop.eup %3174  ;;  %v1400_v7 = vmul.f32 %v3173_v5, %v3157_v19  ;;  %v3098_v19 = vunpack.i.h.bf16 %v3510_v33 }
 0x546   : > { %v1383_v9 = vpop.xlane.xlu0 %1382  ;;  %v1399_v28 = vmul.f32 %v3175_v6, %v3159_v18  ;;  %v1648_v18 = vsel %vm948_vm4, %v935_v23, 0  ;;  %v3143_v23 = vld [vmem:[%s3430_s17] sm:$0xff]  }
 0x547   : > { %3180 = vrcp.f32 %v1383_v9  ;;  %v1408_v12 = vpack.c.bf16 %v1400_v7, %v1400_v7  ;;  %v937_v33 = vpack.c.bf16 %v3098_v19, %v3098_v19 }
 0x548   : > { %v1407_v13 = vpack.c.bf16 %v1399_v28, %v1399_v28 }
 0x549   : > { %2907 = vmatmul.mubr.msk.bf16.vlgmr.msra.gmra.mxu0 %vm948_vm4, %v1408_v12  ;;  %v1740_v41 = vsel %vm948_vm4, %v937_v33, 0 }
 0x54a   : > { %2901 = vmatmul.mubr.msk.bf16.vlgmr.msra.gmra.mxu1 %vm948_vm4, %v1407_v13  ;;  %2917 = vmatpush3.bf16.xpose.msra.mxu0 %v1602_v14  ;;  %v1386_v17 = vpop.xlane.xlu1 %1385 }
 0x54b   : > { %2911 = vmatpush3.bf16.xpose.msra.mxu1 %v1556_v16  ;;  %3182 = vrcp.f32 %v1386_v17  ;;  %2912 = vmatprep.mubr.msk.bf16.mxu1 %vm3308_vm1, %v3307_v36 }
 0x54c   : > { %v3177_v20 = vpop.eup %3176  ;;  %2922 = vmatprep.subr.bf16.mxu1 %v3307_v36  ;;  %2918 = vmatprep.mubr.msk.bf16.mxu0 %vm3308_vm1, %v3307_v36 }
 0x54d   : > { %v1401_v31 = vmul.f32 %v3177_v20, %v3562_v45  ;;  %2928 = vmatprep.subr.bf16.mxu0 %v3307_v36 }
 0x54e   : > { %v1389_v22 = vpop.xlane.xlu0 %1388 }
 0x54f   : > { %3184 = vrcp.f32 %v1389_v22  ;;  %v1409_v10 = vpack.c.bf16 %v1401_v31, %v1401_v31 }
 0x550   : > { %v3179_v24 = vpop.eup %3178 }
 0x551   : > { %v1402_v25 = vmul.f32 %v3179_v24, %v3566_v48 }
 0x552   : > { %2913 = vmatmul.mubr.msk.bf16.vlgmr.msra.gmra.mxu1 %vm948_vm4, %v1409_v10 }
 0x553   : > { %2923 = vmatpush3.bf16.xpose.msra.mxu1 %v1648_v18  ;;  %v1410_v32 = vpack.c.bf16 %v1402_v25, %v1402_v25  ;;  %2924 = vmatprep.mubr.msk.bf16.mxu1 %vm3308_vm1, %v3307_v36 }
 0x554   : > { %v3181_v27 = vpop.eup %3180  ;;  %2934 = vmatprep.subr.bf16.mxu1 %v3307_v36 }
 0x555   : > { %2919 = vmatmul.mubr.msk.bf16.vlgmr.msra.gmra.mxu0 %vm948_vm4, %v1410_v32  ;;  %v1403_v30 = vmul.f32 %v3181_v27, %v3570_v50  ;;  %v2109_v27 = vsub.s32 1, %v3484_v42 }
 0x556   : > { %2929 = vmatpush3.bf16.xpose.msra.mxu0 %v1694_v29  ;;  %2930 = vmatprep.mubr.msk.bf16.mxu0 %vm3308_vm1, %v3307_v36 }
 0x557   : > { %v1411_v34 = vpack.c.bf16 %v1403_v30, %v1403_v30  ;;  %2940 = vmatprep.subr.bf16.mxu0 %v3307_v36  ;;  %v2110_v29 = vrot.slane %v3490_v44, %v2109_v27 }
 0x558   : > { %v3183_v35 = vpop.eup %3182 }
 0x559   : > { %v1404_v37 = vmul.f32 %v3183_v35, %v3574_v52 }
 0x55a   : > { %2925 = vmatmul.mubr.msk.bf16.vlgmr.msra.gmra.mxu1 %vm948_vm4, %v1411_v34 }
 0x55b   : > { %2935 = vmatpush3.bf16.xpose.msra.mxu1 %v1740_v41  ;;  %v1412_v40 = vpack.c.bf16 %v1404_v37, %v1404_v37  ;;  %2936 = vmatprep.mubr.msk.bf16.mxu1 %vm3308_vm1, %v3307_v36 }
 0x55c   : > { %v3185_v45 = vpop.eup %3184  ;;  %2948 = vmatprep.subr.bf16.mxu1 %v3307_v36 }
 0x55d   : > { %2931 = vmatmul.mubr.msk.bf16.vlgmr.msra.gmra.mxu0 %vm948_vm4, %v1412_v40  ;;  %v1405_v46 = vmul.f32 %v3185_v45, %v3578_v53 }
 0x55e   : > { %2944 = vmatprep.mubr.msk.bf16.mxu0 %vm3308_vm1, %v3307_v36  ;;  %2941 = vmatpush3.bf16.msra.mxu0 %v3142_v21  ;;  %v3153_v21 = vld [vmem:[%s3440_s23] sm:$0xff]  }
 0x55f   : > { %v1413_v47 = vpack.c.bf16 %v1405_v46, %v1405_v46  ;;  %2942 = vmatprep.subr.bf16.mxu0 %v3307_v36 }
 0x562   : > { %2937 = vmatmul.mubr.msk.bf16.vlgmr.msra.gmra.mxu1 %vm948_vm4, %v1413_v47  ;;  %2943 = vmatpush3.bf16.msra.mxu0 %v3143_v23 }
 0x563   : > { %2952 = vmatprep.mubr.msk.bf16.mxu1 %vm3308_vm1, %v3307_v36  ;;  %2956 = vmatprep.subr.bf16.mxu0 %v3307_v36 }
 0x601   : > { %v1454_v48 = vpop.f32.mrf.mxu0 }
 0x603   : > { %v2896_v49 = vpop.f32.mrf.mxu0 }
 0x605   : > { %v1457_v50 = vpop.f32.mrf.mxu0 }
 0x607   : > { %v2897_v51 = vpop.f32.mrf.mxu0 }
 0x609   : > { %v1546_v52 = vpop.f32.mrf.mxu0 }
 0x60a   : > { %v1500_v43 = vpop.f32.mrf.mxu1 }
 0x60b   : > { %v2908_v54 = vpop.f32.mrf.mxu0 }
 0x60c   : > { %v2902_v55 = vpop.f32.mrf.mxu1 }
 0x60d   : > { %v1549_v56 = vpop.f32.mrf.mxu0 }
 0x60e   : > { %v1503_v57 = vpop.f32.mrf.mxu1 }
 0x60f   : > { %v2909_v53 = vpop.f32.mrf.mxu0  ;;  %v3144_v57 = vld [vmem:[%s3435_s20 + $0x8] sm:$0xff]  }
 0x610   : > { %v2903_v58 = vpop.f32.mrf.mxu1  ;;  %2949 = vmatpush3.bf16.msra.mxu1 %v3144_v57 }
 0x611   : > { %2950 = vmatprep.subr.bf16.mxu1 %v3307_v36 }
 0x612   : > { %v1592_v59 = vpop.f32.mrf.mxu1 }
 0x614   : > { %v2914_v60 = vpop.f32.mrf.mxu1 }
 0x615   : > { %v1638_v61 = vpop.f32.mrf.mxu0 }
 0x616   : > { %v1595_v62 = vpop.f32.mrf.mxu1  ;;  %v3099_v63 = vpack.i.bf16 %v1638_v61, %v1454_v48 }
 0x617   : > { %v2920_v1 = vpop.f32.mrf.mxu0 }
 0x618   : > { %v2915_v2 = vpop.f32.mrf.mxu1  ;;  %3100 = vxpose.xlu1.b32.start.end [1/1] (short) (narrow) %v3099_v63, 8  ;;  %v2198_v63 = vsub.s32 4, %v3484_v42 }
 0x619   : > { %v1641_v3 = vpop.f32.mrf.mxu0 }
 0x61a   : > { %v1684_v4 = vpop.f32.mrf.mxu1  ;;  %v2199_v3 = vrot.slane %v3490_v44, %v2198_v63 }
 0x61b   : > { %v3106_v5 = vpack.i.bf16 %v1684_v4, %v1500_v43  ;;  %v2921_v6 = vpop.f32.mrf.mxu0  ;;  %v2204_v4 = vsub.s32 5, %v3484_v42 }
 0x61c   : > { %v2926_v7 = vpop.f32.mrf.mxu1 }
 0x61d   : > { %3107 = vxpose.xlu0.b32.start.end [1/1] (short) (narrow) %v3106_v5, 8  ;;  %v1730_v8 = vpop.f32.mrf.mxu0 }
 0x61e   : > { %v1687_v9 = vpop.f32.mrf.mxu1  ;;  %v3113_v28 = vpack.i.bf16 %v1730_v8, %v1546_v52  ;;  %v2205_v8 = vrot.slane %v3490_v44, %v2204_v4  ;;  %v3148_v44 = vld [vmem:[%s3440_s23 + $0x28] sm:$0xff]  }
 0x61f   : > { %v2932_v11 = vpop.f32.mrf.mxu0 }
 0x620   : > { %v2927_v12 = vpop.f32.mrf.mxu1 }
 0x621   : > { %3114 = vxpose.xlu0.b32.start.end [1/1] (short) (narrow) %v3113_v28, 8  ;;  %v1733_v13 = vpop.f32.mrf.mxu0 }
 0x622   : > { %v1776_v14 = vpop.f32.mrf.mxu1  ;;  %v3146_v13 = vld [vmem:[%s3440_s23 + $0x38] sm:$0xff]  }
 0x623   : > { %v3120_v15 = vpack.i.bf16 %v1776_v14, %v1592_v59  ;;  %v2933_v16 = vpop.f32.mrf.mxu0  ;;  %v3147_v14 = vld [vmem:[%s3440_s23 + $0x30] sm:$0xff]  }
 0x624   : > { %v2938_v17 = vpop.f32.mrf.mxu1  ;;  %v3150_v16 = vld [vmem:[%s3440_s23 + $0x18] sm:$0xff]  }
 0x625   : > { %3121 = vxpose.xlu1.b32.start.end [1/1] (short) (narrow) %v3120_v15, 8  ;;  %v3149_v15 = vld [vmem:[%s3440_s23 + $0x20] sm:$0xff]   ;;  %v3151_v17 = vld [vmem:[%s3440_s23 + $0x10] sm:$0xff]  }
 0x626   : > { %v1779_v20 = vpop.f32.mrf.mxu1 }
 0x627   : > { %v3152_v20 = vld [vmem:[%s3440_s23 + $0x8] sm:$0xff]  }
 0x628   : > { %v2939_v31 = vpop.f32.mrf.mxu1 }
 0x629   : > { %v2215_v31 = vsub.s32 2, %v3484_v42 }
 0x694   : > { %v3101_v22 = vpop.trf.xlu1 }
 0x695   : > { %3128 = vxpose.xlu0.b32.start [1/4] (short) (narrow) %v3101_v22, 8  ;;  %v3675_v22 = vld [vmem:[%s3447_s30] sm:$0xff] }
 0x696   : > { %v2216_v23 = vrot.slane %v3675_v22, %v2215_v31 }
 0x699   : > { %v3108_v10 = vpop.trf.xlu0 }
 0x69a   : > { %3130 = vxpose.xlu0.b32.cont [2/4] (short) (narrow) %v3108_v10, 8 }
 0x69d   : > { %v3115_v24 = vpop.trf.xlu0 }
 0x69e   : > { %3132 = vxpose.xlu0.b32.cont [3/4] (short) (narrow) %v3115_v24, 8 }
 0x6a1   : > { %v3122_v25 = vpop.trf.xlu1 }
 0x6a2   : > { %3134 = vxpose.xlu0.b32.end [4/4] (short) (narrow) %v3122_v25, 8 }
 0x712   : > { %v3135_v26 = vpop.trf.xlu0 }
 0x713   : > { %v3139_v19 = vunpack.i.h.bf16 %v3135_v26  ;;  %v3136_v18 = vunpack.i.l.bf16 %v3135_v26 }
 0x715   : > { %v2102_v32 = vpack.c.bf16 %v3139_v19, %v3136_v18 }
 0x717   : > { %2945 = vmatmul.mubr.msk.bf16.vlgmr.msra.gmra.mxu0 %vm549_vm2, %v2102_v32 }
 0x718   : > { %2972 = vmatprep.mubr.msk.bf16.mxu0 %vm3308_vm1, %v3307_v36  ;;  %2957 = vmatpush3.bf16.msra.mxu0 %v3146_v13 }
 0x719   : > { %2958 = vmatprep.subr.bf16.mxu0 %v3307_v36 }
 0x71c   : > { %2959 = vmatpush3.bf16.msra.mxu0 %v3147_v14 }
 0x71d   : > { %2960 = vmatprep.subr.bf16.mxu0 %v3307_v36 }
 0x720   : > { %2961 = vmatpush3.bf16.msra.mxu0 %v3148_v44  ;;  %v2431_v44 = vsub.s32 6, %v3484_v42 }
 0x721   : > { %2962 = vmatprep.subr.bf16.mxu0 %v3307_v36 }
 0x724   : > { %2963 = vmatpush3.bf16.msra.mxu0 %v3149_v15  ;;  %v2437_v15 = vsub.s32 7, %v3484_v42 }
 0x725   : > { %2964 = vmatprep.subr.bf16.mxu0 %v3307_v36 }
 0x728   : > { %2965 = vmatpush3.bf16.msra.mxu0 %v3150_v16  ;;  %v2432_v16 = vrot.slane %v3675_v22, %v2431_v44 }
 0x729   : > { %2966 = vmatprep.subr.bf16.mxu0 %v3307_v36 }
 0x72c   : > { %2967 = vmatpush3.bf16.msra.mxu0 %v3151_v17 }
 0x72d   : > { %2968 = vmatprep.subr.bf16.mxu0 %v3307_v36 }
 0x730   : > { %2969 = vmatpush3.bf16.msra.mxu0 %v3152_v20  ;;  %v2438_v20 = vrot.slane %v3675_v22, %v2437_v15 }
 0x731   : > { %2970 = vmatprep.subr.bf16.mxu0 %v3307_v36 }
 0x734   : > { %2971 = vmatpush3.bf16.msra.mxu0 %v3153_v21 }
 0x7d7   : > { %v2160_v30 = vpop.f32.mrf.mxu0 }
 0x7d8   : > { %v2161_v33 = vadd.f32 %v2160_v30, %v2110_v29 }
 0x7d9   : > { %v2946_v34 = vpop.f32.mrf.mxu0 }
 0x7da   : > { %v2167_v35 = vadd.f32 %v2161_v33, %v3471_v38 }
 0x7db   : > { %v2163_v37 = vpop.f32.mrf.mxu0 }
 0x7dc   : > { %v2164_v41 = vadd.f32 %v2163_v37, %v2110_v29  ;;  %v2169_v40 = vsel %vm549_vm2, %v2167_v35, 0.0 }
 0x7dd   : > { %2170 = vadd.xlane.f32.xlu1 %v2169_v40  ;;  %v2947_v45 = vpop.f32.mrf.mxu0 }
 0x7de   : > { %v2168_v46 = vadd.f32 %v2164_v41, %v3473_v39  ;;  %v3145_v39 = vld [vmem:[%s3435_s20] sm:$0xff]  }
 0x7df   : > { %2951 = vmatpush3.bf16.msra.mxu1 %v3145_v39 }
 0x7e0   : > { %v2172_v47 = vsel %vm549_vm2, %v2168_v46, 0.0 }
 0x7e1   : > { %2173 = vadd.xlane.f32.xlu0 %v2172_v47 }
 0x866   : > { %v2171_v48 = vpop.xlane.xlu1 %2170 }
 0x867   : > { %v2176_v49 = vmul.f32 0.03125, %v2171_v48 }
 0x869   : > { %v2178_v50 = vsub.f32 %v2167_v35, %v2176_v49 }
 0x86a   : > { %v2174_v51 = vpop.xlane.xlu0 %2173 }
 0x86b   : > { %v2177_v52 = vmul.f32 0.03125, %v2174_v51  ;;  %v2180_v43 = vmul.f32 %v2178_v50, %v2178_v50 }
 0x86d   : > { %v2179_v38 = vsub.f32 %v2168_v46, %v2177_v52  ;;  %v2182_v54 = vsel %vm549_vm2, %v2180_v43, 0.0  ;;  %v2310_v43 = vsub.s32 3, %v3484_v42 }
 0x86e   : > { %2183 = vadd.xlane.f32.xlu1 %v2182_v54 }
 0x86f   : > { %v2181_v55 = vmul.f32 %v2179_v38, %v2179_v38 }
 0x871   : > { %v2185_v56 = vsel %vm549_vm2, %v2181_v55, 0.0 }
 0x872   : > { %2186 = vadd.xlane.f32.xlu1 %v2185_v56 }
 0x8f7   : > { %v2184_v53 = vpop.xlane.xlu1 %2183 }
 0x8f8   : > { %v2188_v58 = vmul.f32 0.03125, %v2184_v53 }
 0x8fa   : > { %v2190_v59 = vadd.f32 1e-12, %v2188_v58 }
 0x8fb   : > { %v2187_v60 = vpop.xlane.xlu1 %2186 }
 0x8fc   : > { %3186 = vrsqrt.f32 %v2190_v59  ;;  %v2189_v61 = vmul.f32 0.03125, %v2187_v60 }
 0x8fe   : > { %v2191_v62 = vadd.f32 1e-12, %v2189_v61 }
 0x900   : > { %3188 = vrsqrt.f32 %v2191_v62 }
 0x909   : > { %v3187_v1 = vpop.eup %3186 }
 0x90a   : > { %v2194_v2 = vmul.f32 %v3187_v1, %v2178_v50 }
 0x90c   : > { %v2200_v7 = vmul.f32 %v2199_v3, %v2194_v2 }
 0x90d   : > { %v3189_v5 = vpop.eup %3188 }
 0x90e   : > { %v2195_v6 = vmul.f32 %v3189_v5, %v2179_v38  ;;  %v3651_v28 = vadd.f32 %v2205_v8, %v2200_v7  ;;  %v2311_v38 = vrot.slane %v3675_v22, %v2310_v43 }
 0x910   : > { %v2201_v9 = vmul.f32 %v2199_v3, %v2195_v6 }
 0x912   : > { %v3653_v11 = vadd.f32 %v2205_v8, %v2201_v9 }
 0x914   : > { %v2208_v12 = vpack.c.bf16 %v3653_v11, %v3651_v28 }
 0x916   : > { %2953 = vmatmul.mubr.msk.bf16.vlgmr.msra.gmra.mxu1 %vm549_vm2, %v2208_v12 }
 0x9d6   : > { %v2266_v10 = vpop.f32.mrf.mxu1 }
 0x9d7   : > { %v2267_v24 = vadd.f32 %v2266_v10, %v2216_v23 }
 0x9d8   : > { %v2954_v25 = vpop.f32.mrf.mxu1 }
 0x9d9   : > { %v2273_v26 = vmul.f32 %v2267_v24, %v2267_v24 }
 0x9da   : > { %v2269_v19 = vpop.f32.mrf.mxu1 }
 0x9db   : > { %v2275_v18 = vmul.f32 %v2273_v26, %v2267_v24  ;;  %v2270_v32 = vadd.f32 %v2269_v19, %v2216_v23 }
 0x9dc   : > { %v2955_v27 = vpop.f32.mrf.mxu1 }
 0x9dd   : > { %v2277_v29 = vmul.f32 0.044715, %v2275_v18  ;;  %v2274_v36 = vmul.f32 %v2270_v32, %v2270_v32 }
 0x9df   : > { %v2279_v30 = vadd.f32 %v2277_v29, %v2267_v24  ;;  %v2276_v33 = vmul.f32 %v2274_v36, %v2270_v32 }
 0x9e1   : > { %v2281_v34 = vmul.f32 0.7978846, %v2279_v30  ;;  %v2278_v35 = vmul.f32 0.044715, %v2276_v33 }
 0x9e3   : > { %3190 = vtanh.f32 %v2281_v34  ;;  %v2280_v37 = vadd.f32 %v2278_v35, %v2270_v32 }
 0x9e5   : > { %v2282_v41 = vmul.f32 0.7978846, %v2280_v37 }
 0x9e7   : > { %3192 = vtanh.f32 %v2282_v41 }
 0x9f0   : > { %v3191_v40 = vpop.eup %3190 }
 0x9f1   : > { %v2285_v45 = vadd.f32 1.0, %v3191_v40 }
 0x9f3   : > { %v2287_v47 = vmul.f32 0.5, %v2285_v45 }
 0x9f4   : > { %v3193_v46 = vpop.eup %3192 }
 0x9f5   : > { %v2286_v48 = vadd.f32 1.0, %v3193_v46  ;;  %v2289_v50 = vmul.f32 %v2287_v47, %v2267_v24 }
 0x9f7   : > { %v2288_v49 = vmul.f32 0.5, %v2286_v48 }
 0x9f9   : > { %v2290_v51 = vmul.f32 %v2288_v49, %v2270_v32 }
 0x9fb   : > { %v2291_v52 = vpack.c.bf16 %v2290_v51, %v2289_v50 }
 0x9fd   : > { %2973 = vmatmul.mubr.bf16.vlgmr.msra.gmra.mxu0 %v2291_v52 }
 0xabd   : > { %v2394_v54 = vpop.f32.mrf.mxu0 }
 0xabe   : > { %v2395_v55 = vadd.f32 %v2394_v54, %v2311_v38 }
 0xabf   : > { %v2974_v56 = vpop.f32.mrf.mxu0 }
 0xac0   : > { %v2401_v57 = vadd.f32 %v2395_v55, %v3651_v28 }
 0xac1   : > { %v2397_v39 = vpop.f32.mrf.mxu0 }
 0xac2   : > { %v2398_v53 = vadd.f32 %v2397_v39, %v2311_v38  ;;  %v2403_v58 = vsel %vm549_vm2, %v2401_v57, 0.0 }
 0xac3   : > { %2404 = vadd.xlane.f32.xlu1 %v2403_v58  ;;  %v2975_v59 = vpop.f32.mrf.mxu0 }
 0xac4   : > { %v2402_v60 = vadd.f32 %v2398_v53, %v3653_v11 }
 0xac6   : > { %v2406_v61 = vsel %vm549_vm2, %v2402_v60, 0.0 }
 0xac7   : > { %2407 = vadd.xlane.f32.xlu1 %v2406_v61 }
 0xb4c   : > { %v2405_v62 = vpop.xlane.xlu1 %2404 }
 0xb4d   : > { %v2409_v63 = vmul.f32 0.03125, %v2405_v62 }
 0xb4f   : > { %v2411_v1 = vsub.f32 %v2401_v57, %v2409_v63 }
 0xb50   : > { %v2408_v2 = vpop.xlane.xlu1 %2407 }
 0xb51   : > { %v2410_v3 = vmul.f32 0.03125, %v2408_v2  ;;  %v2413_v4 = vmul.f32 %v2411_v1, %v2411_v1 }
 0xb53   : > { %v2412_v5 = vsub.f32 %v2402_v60, %v2410_v3  ;;  %v2415_v6 = vsel %vm549_vm2, %v2413_v4, 0.0 }
 0xb54   : > { %2416 = vadd.xlane.f32.xlu1 %v2415_v6 }
 0xb55   : > { %v2414_v7 = vmul.f32 %v2412_v5, %v2412_v5 }
 0xb57   : > { %v2418_v8 = vsel %vm549_vm2, %v2414_v7, 0.0 }
 0xb58   : > { %2419 = vadd.xlane.f32.xlu0 %v2418_v8 }
 0xbdd   : > { %v2417_v9 = vpop.xlane.xlu1 %2416 }
 0xbde   : > { %v2421_v28 = vmul.f32 0.03125, %v2417_v9 }
 0xbe0   : > { %v2423_v11 = vadd.f32 1e-12, %v2421_v28 }
 0xbe1   : > { %v2420_v12 = vpop.xlane.xlu0 %2419 }
 0xbe2   : > { %3194 = vrsqrt.f32 %v2423_v11  ;;  %v2422_v13 = vmul.f32 0.03125, %v2420_v12 }
 0xbe4   : > { %v2424_v14 = vadd.f32 1e-12, %v2422_v13 }
 0xbe6   : > { %3196 = vrsqrt.f32 %v2424_v14 }
 0xbef   : > { %v3195_v17 = vpop.eup %3194 }
 0xbf0   : > { %v2427_v21 = vmul.f32 %v3195_v17, %v2411_v1 }
 0xbf2   : > { %v2433_v23 = vmul.f32 %v2432_v16, %v2427_v21 }
 0xbf3   : > { %v3197_v10 = vpop.eup %3196 }
 0xbf4   : > { %v2439_v24 = vadd.f32 %v2438_v20, %v2433_v23  ;;  %v2428_v25 = vmul.f32 %v3197_v10, %v2412_v5 }
 0xbf6   : > { %2441 = vst.msk [vmem:[#allocation2] sm:$0xff] %vm549_vm2, %v2439_v24  ;;  %v2434_v26 = vmul.f32 %v2432_v16, %v2428_v25  ;;  %2446 = sbr.rel (%p2765_p6) target bundleno = 3795 (0xed3), region = 76 }
 0xbf8   : > { %v2440_v19 = vadd.f32 %v2438_v20, %v2434_v26 }
 0xbfa   : > { %2442 = vst.msk [vmem:[#allocation2 + $0x8] sm:$0xff] %vm549_vm2, %v2440_v19 }
 0xbfb   : > { %v3199_v18 = vld [vmem:[%s3740_s8 + $0x8] sm:$0xff]   ;;  %v2447_v32 = vpack.c.bf16 %v2439_v24, %v2439_v24  ;;  %v2448_v22 = vpack.c.bf16 %v2440_v19, %v2440_v19  ;;  %v3310_v27 = vmov 0.0   ;;  %v3200_v29 = vld [vmem:[%s3740_s8] sm:$0xff]   ;;  %vm3311_vm5 = vmmov 0  }
 0xbfc   : > { %2976 = vmatprep.subr.bf16.mxu0 %v3310_v27  ;;  %2984 = vmatprep.subr.bf16.mxu1 %v3310_v27  ;;  %vm2462_vm6 = vcmask 1041409   ;;  %v3201_v37 = vld [vmem:[%s3741_s9 + $0x8] sm:$0xff]   ;;  %v3202_v41 = vld [vmem:[%s3741_s9] sm:$0xff]   ;;  %v2456_v40 = vrot.slane %v3442_v0, %v2215_v31  ;;  %v2529_v52 = vrot.slane %v3442_v0, %v2310_v43  ;;  %vm2585_vm7 = vcmask 1041408  }
 0xbfd   : > { %2977 = vmatpush3.bf16.msra.mxu0 %v3199_v18  ;;  %2980 = vmatprep.mubr.msk.bf16.mxu0 %vm3311_vm5, %v3310_v27  ;;  %v2459_v36 = vunpack.c.l.b16 %v2447_v32  ;;  %v2460_v30 = vunpack.c.l.b16 %v2448_v22 }
 0xbfe   : > { %2978 = vmatprep.subr.bf16.mxu0 %v3310_v27  ;;  %2988 = vmatprep.mubr.msk.bf16.mxu1 %vm3311_vm5, %v3310_v27 }
 0xbff   : > { %v2461_v33 = vrot.slane %v2460_v30, 7  ;;  %2985 = vmatpush3.bf16.msra.mxu1 %v3201_v37 }
 0xc00   : > { %2986 = vmatprep.subr.bf16.mxu1 %v3310_v27 }
 0xc01   : > { %2979 = vmatpush3.bf16.msra.mxu0 %v3200_v29  ;;  %v2463_v34 = vsel %vm2462_vm6, %v2461_v33, %v2459_v36 }
 0xc02   : > { %v2464_v35 = vpack.c.b16 %v2463_v34, %v2463_v34 }
 0xc03   : > { %2987 = vmatpush3.bf16.msra.mxu1 %v3202_v41 }
 0xc04   : > { %2981 = vmatmul.mubr.msk.bf16.vlgmr.msra.gmra.mxu0 %vm549_vm2, %v2464_v35 }
 0xcc4   : > { %v2514_v45 = vpop.f32.mrf.mxu0 }
 0xcc5   : > { %v2515_v46 = vadd.f32 %v2514_v45, %v2456_v40 }
 0xcc6   : > { %v2982_v47 = vpop.f32.mrf.mxu0 }
 0xcc7   : > { %3203 = vtanh.f32 %v2515_v46 }
 0xcc8   : > { %v2517_v48 = vpop.f32.mrf.mxu0 }
 0xcca   : > { %v2983_v49 = vpop.f32.mrf.mxu0 }
 0xcd4   : > { %v3204_v50 = vpop.eup %3203 }
 0xcd5   : > { %v2521_v51 = vpack.c.bf16 %v3204_v50, %v3204_v50 }
 0xcd7   : > { %2989 = vmatmul.mubr.msk.bf16.vlgmr.msra.gmra.mxu1 %vm549_vm2, %v2521_v51 }
 0xd97   : > { %v2579_v38 = vpop.f32.mrf.mxu1 }
 0xd98   : > { %v2580_v54 = vadd.f32 %v2579_v38, %v2529_v52 }
 0xd99   : > { %v2990_v55 = vpop.f32.mrf.mxu1 }
 0xd9a   : > { %v2586_v56 = vsel %vm2585_vm7, %v2580_v54, -inf }
 0xd9b   : > { %2587 = vmax.xlane.f32.xlu0 %v2586_v56  ;;  %v2582_v31 = vpop.f32.mrf.mxu1 }
 0xd9d   : > { %v2991_v57 = vpop.f32.mrf.mxu1 }
 0xe24   : > { %v2588_v39 = vpop.xlane.xlu0 %2587 }
 0xe25   : > { %v2589_v53 = vsub.f32 %v2580_v54, %v2588_v39 }
 0xe27   : > { %v2590_v58 = vmul.f32 1.442695, %v2589_v53 }
 0xe29   : > { %3205 = vpow2.f32 %v2590_v58 }
 0xe36   : > { %v3206_v59 = vpop.eup %3205 }
 0xe37   : > { %v2592_v60 = vsel %vm2585_vm7, %v3206_v59, 0.0 }
 0xe38   : > { %2593 = vadd.xlane.f32.xlu0 %v2592_v60 }
 0xec1   : > { %v2594_v61 = vpop.xlane.xlu0 %2593 }
 0xec2   : > { %3207 = vrcp.f32 %v2594_v61 }
 0xecf   : > { %v3208_v42 = vpop.eup %3207 }
 0xed0   : > { %v2596_v62 = vmul.f32 %v3208_v42, %v3206_v59 }
 0xed2   : > { %2597 = vst [vmem:[#allocation8] sm:$0x3] %v2596_v62 }
 0xed3 PF: > { %p3015_p13 = scmp.eq.s32.totalorder %s3374_s14, 1  ;;  %s3312_s22 = smov [#allocation8]  }
 0xed4   : > { %s2605_s23 = sshll.u32 %s3312_s22, 4  ;;  %s2606_s23 = int_to_ptr.vmem [resolvable:$true] %s2605_s23 }
 0xed5   : > { %s3261_s24 = scalar_lea.vmem %s2606_s23, 32  ;;  %p3268_p8 = scmp.lt.s32.totalorder %s2606_s23, %s2606_s23 }
 0xed6   : > { %p3262_p0 = scmp.ne.s32.totalorder %s2606_s23, %s3261_s24  ;;  %p3269_p9 = scmp.lt.s32.totalorder %s3261_s24, %s3261_s24 }
 0xed8   : > { %p3263_p1 = pnand %p3262_p0, %p3015_p13  ;;  %p3270_p10 = por %p3269_p9, %p3268_p8 }
 0xeda   : > { %p3264_p5 = pneg %p3263_p1 }
 0xedc   : > { %p3271_p11 = pnand %p3270_p10, %p3264_p5 }
 0xede   : > { %3274 = shalt.err (!%p3271_p11)
}
 0xedf   : > { %3001 = dma.vmem_to_hbm [thread:$0]  (%p3015_p13), %s2606_s23, 32, %s3742_s10, [#allocation5]  }
 0xee0   : > { %3298 = dma.done.wait (%p3015_p13), [#allocation5], 32  }
 0xee1   : > { %3300 = vsyncadd (%p3015_p13), [#allocation5], 4294967264 }
 0xee2 PF: > { %s23_s13 = sadd.s32 1, %s3303_s13  }
 0xee3   : > { %p20_p7 = scmp.ge.s32.totalorder %s23_s13, 4  }
 0xee5   :  { %22 = sbr.rel (!%p20_p7) target bundleno = 3 (0x3), region = 116 }
 0xeea   :  { %2618 = vsyncpa [#allocation4], 1 }
 0xeeb   :  { %2620 = vsyncpa [#allocation4 + $0x1], 1 }
 0xeec   :  { %2621 = vsyncpa [#allocation7], 1 }
 0xeed   :  { %2622 = vsyncpa [#allocation5], 1 }
 0xeee   :  { %2624 = vsyncpa [#allocation5 + $0x1], 1 }

</bundles_post_ra>
